<compile_context>
chip_gen: v7x
topology: tpu7x:2x2x1
jax: 0.10.0
libtpu: 0.0.40
codegen_flags: <defaults>
</compile_context>

<pallas_src>
import math
import numpy as np
import jax
import jax.numpy as jnp
from jax import lax
from jax.experimental import pallas as pl
from jax.experimental.pallas import tpu as pltpu

# ---- model hyper-parameters (small, consistent with the module's __init__) ----
VOCAB = 16
HIDDEN = 32
SEQ = 8
NUM_LAYERS = 2
NHEAD = 4
HEAD_DIM = HIDDEN // NHEAD
FFN = 4 * HIDDEN
EPS = 1e-5            # nn.LayerNorm / TransformerEncoderLayer default
BATCH = 2
NROWS = BATCH * SEQ   # batch folded into the matmul row dimension
LANES = 128           # slab lane width

# ------------------------- single parameter-slab layout -------------------------
# (rows, 128) f32; every block starts on a multiple of 8 rows and is read with a
# full-lane-width static ref slice inside the kernel.
_EMBPE_BASE = 0                                   # emb @ lanes[0:32], pe_all @ [32:64]
_EMBPE_ROWS = max(VOCAB, NROWS)                   # 16
_LAYERW_BASE = _EMBPE_BASE + _EMBPE_ROWS          # 16
_LAYERW_ROWS_PER = 2 * HIDDEN                     # 64: [wqkv|wo] rows, then w1 rows
_W2_BASE = _LAYERW_BASE + NUM_LAYERS * _LAYERW_ROWS_PER   # 144, w2[l] @ lanes[l*32:(l+1)*32]
_W2_ROWS = FFN                                    # 128
_CONST_BASE = _W2_BASE + _W2_ROWS                 # 272: R | neg_stack | head_mask
_CONST_ROWS = NHEAD * NROWS                       # 64
_R_COL = 0                                        # lanes [0:16)   replication matrix
_NEG_COL = NROWS                                  # lanes [16:32)  additive attn mask
_HM_COL = 2 * NROWS                               # lanes [32:64)  head mask
_WOUT_BASE = _CONST_BASE + _CONST_ROWS            # 336: wout padded to 128 lanes
_WOUT_ROWS = HIDDEN                               # 32
_VEC_BASE = _WOUT_BASE + _WOUT_ROWS               # 368: per-layer + final vectors
_VEC_ROWS_PER_LAYER = 8
_VEC_ROWS = NUM_LAYERS * _VEC_ROWS_PER_LAYER + 3  # 19
_TOTAL_ROWS = ((_VEC_BASE + _VEC_ROWS + 7) // 8) * 8   # 392


# ----------------------------- shared math helpers -----------------------------
def _layernorm(x, g, b):
    m = jnp.mean(x, axis=-1, keepdims=True)
    v = jnp.mean((x - m) ** 2, axis=-1, keepdims=True)
    return (x - m) * lax.rsqrt(v + EPS) * g + b


def _erf(z):
    # Abramowitz & Stegun 7.1.26, |error| < 1.5e-7 — only exp/mul/add/where, so it
    # lowers cleanly in Mosaic while matching PyTorch's exact erf-GELU.
    az = jnp.maximum(z, -z)
    t = 1.0 / (1.0 + 0.3275911 * az)
    poly = t * (0.254829592 + t * (-0.284496736 + t * (1.421413741
               + t * (-1.453152027 + t * 1.061405429))))
    y = 1.0 - poly * jnp.exp(-az * az)
    return jnp.where(z < 0, -y, y)


def _gelu(x):
    return 0.5 * x * (1.0 + _erf(x * (1.0 / math.sqrt(2.0))))


# --------------------------------- the kernel ----------------------------------
def _char_transformer_kernel(tok_ref, slab_ref, out_ref):
    f32 = jnp.float32

    # ---- constant / parameter loads (8-aligned row blocks, full 128 lanes) ----
    embpe = slab_ref[_EMBPE_BASE:_EMBPE_BASE + _EMBPE_ROWS, :]      # (16, 128)
    emb = embpe[0:VOCAB, 0:HIDDEN]                                  # (16, 32)
    pe_all = embpe[0:NROWS, HIDDEN:2 * HIDDEN]                      # (16, 32)

    cst = slab_ref[_CONST_BASE:_CONST_BASE + _CONST_ROWS, :]        # (64, 128)
    rep = cst[:, _R_COL:_R_COL + NROWS]                             # (64, 16) 0/1
    neg_stack = cst[:, _NEG_COL:_NEG_COL + NROWS]                   # (64, 16) 0/-1e30
    head_mask = cst[:, _HM_COL:_HM_COL + HIDDEN]                    # (64, 32) 0/1

    vecs = slab_ref[_VEC_BASE:_TOTAL_ROWS, :]                       # (24, 128)

    # ---- embedding gather as a one-hot matmul on the MXU ----
    tok = tok_ref[...]                                              # (16, 1) int32
    vid = lax.broadcasted_iota(jnp.int32, (NROWS, VOCAB), 1)
    onehot = (tok == vid).astype(f32)                               # (16, 16)
    x = (jnp.dot(onehot, emb, preferred_element_type=f32) * math.sqrt(HIDDEN)
         + pe_all)                                                  # (16, 32)

    scale = 1.0 / math.sqrt(HEAD_DIM)

    for l in range(NUM_LAYERS):                                     # static unroll
        lb = _LAYERW_BASE + l * _LAYERW_ROWS_PER
        wqkv_wo = slab_ref[lb:lb + HIDDEN, :]                       # (32, 128)
        wqkv = wqkv_wo[:, 0:3 * HIDDEN]                             # (32, 96)
        wo = wqkv_wo[:, 3 * HIDDEN:4 * HIDDEN]                      # (32, 32)
        w1 = slab_ref[lb + HIDDEN:lb + 2 * HIDDEN, :]               # (32, 128)
        w2 = slab_ref[_W2_BASE:_W2_BASE + _W2_ROWS, :][:, l * HIDDEN:(l + 1) * HIDDEN]

        vb = l * _VEC_ROWS_PER_LAYER
        ln1g = vecs[vb + 0:vb + 1, 0:HIDDEN]
        ln1b = vecs[vb + 1:vb + 2, 0:HIDDEN]
        bqkv = vecs[vb + 2:vb + 3, 0:3 * HIDDEN]
        bo = vecs[vb + 3:vb + 4, 0:HIDDEN]
        ln2g = vecs[vb + 4:vb + 5, 0:HIDDEN]
        ln2b = vecs[vb + 5:vb + 6, 0:HIDDEN]
        b1 = vecs[vb + 6:vb + 7, 0:FFN]
        b2 = vecs[vb + 7:vb + 8, 0:HIDDEN]

        # ---- self-attention block (norm_first) ----
        h = _layernorm(x, ln1g, ln1b)
        qkv = jnp.dot(h, wqkv, preferred_element_type=f32) + bqkv   # (16, 96)
        q = qkv[:, 0:HIDDEN] * scale
        k = qkv[:, HIDDEN:2 * HIDDEN]
        v = qkv[:, 2 * HIDDEN:3 * HIDDEN]

        # All heads at once: replicate q per head with one MXU matmul (rep is the
        # precomputed (64,16) replication matrix), zero other heads' columns with
        # the precomputed block-diagonal head mask, then one full-width score
        # matmul and one PV matmul; cross-head garbage is masked before the
        # head-sum and the out-projection is one full-width matmul.
        q_stack = jnp.dot(rep, q, preferred_element_type=f32) * head_mask   # (64, 32)
        s = jnp.dot(q_stack, k.T, preferred_element_type=f32) + neg_stack   # (64, 16)
        m = jnp.max(s, axis=-1, keepdims=True)
        e = jnp.exp(s - m)
        p = e * pl.reciprocal(jnp.sum(e, axis=-1, keepdims=True), approx=True)
        ov = jnp.dot(p, v, preferred_element_type=f32) * head_mask          # (64, 32)
        o = (ov[0:NROWS] + ov[NROWS:2 * NROWS]
             + ov[2 * NROWS:3 * NROWS] + ov[3 * NROWS:4 * NROWS])           # (16, 32)
        x = x + jnp.dot(o, wo, preferred_element_type=f32) + bo

        # ---- feed-forward block (norm_first) ----
        h = _layernorm(x, ln2g, ln2b)
        f = _gelu(jnp.dot(h, w1, preferred_element_type=f32) + b1)          # (16, 128)
        x = x + jnp.dot(f, w2, preferred_element_type=f32) + b2

    # final LayerNorm + (identity dropout) + lane-dense output projection
    fb = NUM_LAYERS * _VEC_ROWS_PER_LAYER
    y = _layernorm(x, vecs[fb + 0:fb + 1, 0:HIDDEN], vecs[fb + 1:fb + 2, 0:HIDDEN])
    bout = vecs[fb + 2:fb + 3, :]                                           # (1, 128)
    wout = slab_ref[_WOUT_BASE:_WOUT_BASE + _WOUT_ROWS, :]                  # (32, 128)
    out_ref[...] = jnp.dot(y, wout, preferred_element_type=f32) + bout      # (16, 128)


# ------------------------------ parameter packing -------------------------------
def pack_params(p):
    """One-time packing of all parameters + constants into a single (392,128) slab."""
    slab = np.zeros((_TOTAL_ROWS, LANES), np.float32)

    # embedding table + batch-tiled positional encoding (share the first 16 rows)
    slab[0:VOCAB, 0:HIDDEN] = np.asarray(p["emb_table"], np.float32)
    slab[0:NROWS, HIDDEN:2 * HIDDEN] = np.tile(np.asarray(p["pe"], np.float32), (BATCH, 1))

    # per-layer 2-D weights
    for l in range(NUM_LAYERS):
        b = _LAYERW_BASE + l * _LAYERW_ROWS_PER
        slab[b:b + HIDDEN, 0:3 * HIDDEN] = np.asarray(p["wqkv"][l], np.float32)
        slab[b:b + HIDDEN, 3 * HIDDEN:4 * HIDDEN] = np.asarray(p["wo"][l], np.float32)
        slab[b + HIDDEN:b + 2 * HIDDEN, 0:FFN] = np.asarray(p["w1"][l], np.float32)
        slab[_W2_BASE:_W2_BASE + FFN, l * HIDDEN:(l + 1) * HIDDEN] = \
            np.asarray(p["w2"][l], np.float32)

    # constants: head replication matrix, stacked additive attn mask, head mask
    rep = np.zeros((NHEAD * NROWS, NROWS), np.float32)
    hm = np.zeros((NHEAD * NROWS, HIDDEN), np.float32)
    for h in range(NHEAD):
        rep[h * NROWS:(h + 1) * NROWS, :] = np.eye(NROWS, dtype=np.float32)
        hm[h * NROWS:(h + 1) * NROWS, h * HEAD_DIM:(h + 1) * HEAD_DIM] = 1.0
    r = np.arange(NROWS)
    allowed = ((r[:, None] // SEQ) == (r[None, :] // SEQ)) & (r[None, :] <= r[:, None])
    neg = np.where(allowed, 0.0, -1e30).astype(np.float32)
    neg_stack = np.tile(neg, (NHEAD, 1))
    cb = _CONST_BASE
    slab[cb:cb + NHEAD * NROWS, _R_COL:_R_COL + NROWS] = rep
    slab[cb:cb + NHEAD * NROWS, _NEG_COL:_NEG_COL + NROWS] = neg_stack
    slab[cb:cb + NHEAD * NROWS, _HM_COL:_HM_COL + HIDDEN] = hm

    # lane-padded output head
    slab[_WOUT_BASE:_WOUT_BASE + HIDDEN, 0:VOCAB] = np.asarray(p["wout"], np.float32)

    # per-layer / final vectors (one 128-lane row each, zero-padded)
    def setrow(rix, v):
        v = np.asarray(v, np.float32).reshape(-1)
        slab[rix, 0:v.shape[0]] = v

    for l in range(NUM_LAYERS):
        vb = _VEC_BASE + l * _VEC_ROWS_PER_LAYER
        setrow(vb + 0, p["ln1g"][l]); setrow(vb + 1, p["ln1b"][l])
        setrow(vb + 2, p["bqkv"][l]); setrow(vb + 3, p["bo"][l])
        setrow(vb + 4, p["ln2g"][l]); setrow(vb + 5, p["ln2b"][l])
        setrow(vb + 6, p["b1"][l]);   setrow(vb + 7, p["b2"][l])
    fb = _VEC_BASE + NUM_LAYERS * _VEC_ROWS_PER_LAYER
    setrow(fb + 0, p["lnfg"][0]); setrow(fb + 1, p["lnfb"][0]); setrow(fb + 2, p["bout"][0])

    return jnp.asarray(slab)


# ------------------------------ wrapper / pallas_call ---------------------------
def char_transformer_forward(tokens, slab):
    B, S = tokens.shape
    assert (B, S) == (BATCH, SEQ), "kernel is specialized to (BATCH, SEQ)"
    tok_col = tokens.reshape(B * S, 1).astype(jnp.int32)

    out = pl.pallas_call(
        _char_transformer_kernel,
        out_shape=jax.ShapeDtypeStruct((NROWS, LANES), jnp.float32),
        grid=(1,),
        in_specs=[
            pl.BlockSpec((NROWS, 1), lambda i: (0, 0)),            # tokens column
            pl.BlockSpec((_TOTAL_ROWS, LANES), lambda i: (0, 0)),  # one param slab DMA
        ],
        out_specs=pl.BlockSpec((NROWS, LANES), lambda i: (0, 0)),
        compiler_params=pltpu.CompilerParams(dimension_semantics=("arbitrary",)),
        cost_estimate=pl.CostEstimate(flops=1_350_000, transcendentals=6_500,
                                      bytes_accessed=210_000),
    )(tok_col, slab)
    return out[:, :VOCAB].reshape(B, S, VOCAB)


# ------------------------------ deterministic params ----------------------------
def init_params(key):
    keys = jax.random.split(key, 10)

    def u(k, shape, a=0.1):
        return jax.random.uniform(k, shape, jnp.float32, -a, a)

    # sinusoidal positional encoding (max_len = seq_length)
    pos = np.arange(SEQ)[:, None].astype(np.float32)
    div = np.exp(np.arange(0, HIDDEN, 2).astype(np.float32) * (-math.log(10000.0) / HIDDEN))
    pe = np.zeros((SEQ, HIDDEN), np.float32)
    pe[:, 0::2] = np.sin(pos * div)
    pe[:, 1::2] = np.cos(pos * div)

    return {
        "emb_table": u(keys[0], (VOCAB, HIDDEN)),                    # uniform(-0.1, 0.1)
        "pe": jnp.asarray(pe),
        "ln1g": jnp.ones((NUM_LAYERS, HIDDEN), jnp.float32),
        "ln1b": jnp.zeros((NUM_LAYERS, HIDDEN), jnp.float32),
        "wqkv": u(keys[1], (NUM_LAYERS, HIDDEN, 3 * HIDDEN)),        # in_proj_weight^T
        "bqkv": u(keys[2], (NUM_LAYERS, 3 * HIDDEN), 0.02),
        "wo":   u(keys[3], (NUM_LAYERS, HIDDEN, HIDDEN)),            # out_proj.weight^T
        "bo":   u(keys[4], (NUM_LAYERS, HIDDEN), 0.02),
        "ln2g": jnp.ones((NUM_LAYERS, HIDDEN), jnp.float32),
        "ln2b": jnp.zeros((NUM_LAYERS, HIDDEN), jnp.float32),
        "w1":   u(keys[5], (NUM_LAYERS, HIDDEN, FFN)),               # linear1.weight^T
        "b1":   u(keys[6], (NUM_LAYERS, FFN), 0.02),
        "w2":   u(keys[7], (NUM_LAYERS, FFN, HIDDEN)),               # linear2.weight^T
        "b2":   u(keys[8], (NUM_LAYERS, HIDDEN), 0.02),
        "lnfg": jnp.ones((1, HIDDEN), jnp.float32),
        "lnfb": jnp.zeros((1, HIDDEN), jnp.float32),
        "wout": u(keys[9], (HIDDEN, VOCAB)),                         # fc_out.weight^T
        "bout": jnp.zeros((1, VOCAB), jnp.float32),                  # fc_out.bias = 0
    }


# ------------------------------- pure-JAX reference ------------------------------
def _ref_single(tokens_1d, p):
    x = jnp.take(p["emb_table"], tokens_1d, axis=0) * math.sqrt(HIDDEN) + p["pe"]
    row_i = jnp.arange(SEQ)[:, None]
    col_i = jnp.arange(SEQ)[None, :]
    neg = jnp.where(col_i > row_i, -1e30, 0.0).astype(jnp.float32)
    for l in range(NUM_LAYERS):
        h = _layernorm(x, p["ln1g"][l], p["ln1b"][l])
        qkv = h @ p["wqkv"][l] + p["bqkv"][l]
        q, k, v = qkv[:, :HIDDEN], qkv[:, HIDDEN:2 * HIDDEN], qkv[:, 2 * HIDDEN:]
        attn = jnp.zeros((SEQ, HIDDEN), jnp.float32) + p["bo"][l]
        for hd in range(NHEAD):
            sl = slice(hd * HEAD_DIM, (hd + 1) * HEAD_DIM)
            s = (q[:, sl] / math.sqrt(HEAD_DIM)) @ k[:, sl].T + neg
            pw = jax.nn.softmax(s, axis=-1)
            attn = attn + (pw @ v[:, sl]) @ p["wo"][l][sl, :]
        x = x + attn
        h = _layernorm(x, p["ln2g"][l], p["ln2b"][l])
        x = x + (jax.nn.gelu(h @ p["w1"][l] + p["b1"][l], approximate=False)
                 @ p["w2"][l] + p["b2"][l])
    y = _layernorm(x, p["lnfg"][0], p["lnfb"][0])
    return y @ p["wout"] + p["bout"][0]


# -------------------------------------- main -------------------------------------
if __name__ == "__main__":
    key = jax.random.PRNGKey(0)
    k_tok, k_par = jax.random.split(key)
    params = init_params(k_par)
    slab = pack_params(params)
    tokens = jax.random.randint(k_tok, (BATCH, SEQ), 0, VOCAB, dtype=jnp.int32)

    out = jax.block_until_ready(char_transformer_forward(tokens, slab))
    assert out.shape == (BATCH, SEQ, VOCAB) and out.dtype == jnp.float32

    ref = jax.block_until_ready(jax.vmap(lambda t: _ref_single(t, params))(tokens))
    np.testing.assert_allclose(np.asarray(out), np.asarray(ref), rtol=2e-2, atol=2e-2)

    print("KERNEL_OK")
</pallas_src>

<mosaic_0001>
module attributes {stable_mosaic.version = 11 : i64} {
  func.func @_char_transformer_kernel(%arg0: i32, %arg1: memref<16x1xi32, #tpu.memory_space<vmem>>, %arg2: memref<392x128xf32, #tpu.memory_space<vmem>>, %arg3: memref<16x128xf32, #tpu.memory_space<vmem>>) attributes {dimension_semantics = [#tpu.dimension_semantics<arbitrary>], iteration_bounds = array<i64: 1>, scalar_prefetch = 0 : i64, scratch_operands = 0 : i64, tpu.core_type = #tpu.core_type<tc>, window_params = [{pipeline_mode = #tpu.pipeline_mode<synchronous>, transform_indices = @transform_0, window_bounds = array<i64: 16, 1>}, {pipeline_mode = #tpu.pipeline_mode<synchronous>, transform_indices = @transform_1, window_bounds = array<i64: 392, 128>}, {pipeline_mode = #tpu.pipeline_mode<synchronous>, transform_indices = @transform_2, window_bounds = array<i64: 16, 128>}]} {
    %c0 = arith.constant 0 : index
    %c0_0 = arith.constant 0 : index
    %0 = vector.load %arg2[%c0, %c0_0] : memref<392x128xf32, #tpu.memory_space<vmem>>, vector<16x128xf32>
    %1 = vector.extract_strided_slice %0 {offsets = [0, 0], sizes = [16, 32], strides = [1, 1]} : vector<16x128xf32> to vector<16x32xf32>
    %2 = vector.extract_strided_slice %0 {offsets = [0, 32], sizes = [16, 32], strides = [1, 1]} : vector<16x128xf32> to vector<16x32xf32>
    %c272 = arith.constant 272 : index
    %c0_1 = arith.constant 0 : index
    %3 = vector.load %arg2[%c272, %c0_1] : memref<392x128xf32, #tpu.memory_space<vmem>>, vector<64x128xf32>
    %4 = vector.extract_strided_slice %3 {offsets = [0, 0], sizes = [64, 16], strides = [1, 1]} : vector<64x128xf32> to vector<64x16xf32>
    %5 = vector.extract_strided_slice %3 {offsets = [0, 16], sizes = [64, 16], strides = [1, 1]} : vector<64x128xf32> to vector<64x16xf32>
    %6 = vector.extract_strided_slice %3 {offsets = [0, 32], sizes = [64, 32], strides = [1, 1]} : vector<64x128xf32> to vector<64x32xf32>
    %c368 = arith.constant 368 : index
    %c0_2 = arith.constant 0 : index
    %7 = vector.load %arg2[%c368, %c0_2] : memref<392x128xf32, #tpu.memory_space<vmem>>, vector<24x128xf32>
    %c0_3 = arith.constant 0 : index
    %c0_4 = arith.constant 0 : index
    %8 = vector.load %arg1[%c0_3, %c0_4] : memref<16x1xi32, #tpu.memory_space<vmem>>, vector<16x1xi32>
    %9 = tpu.iota {dimensions = array<i32: 1>} : vector<16x16xi32>
    %10 = vector.broadcast %8 : vector<16x1xi32> to vector<16x16xi32>
    %11 = arith.cmpi eq, %10, %9 : vector<16x16xi32>
    %12 = arith.extui %11 : vector<16x16xi1> to vector<16x16xi32>
    %13 = arith.sitofp %12 : vector<16x16xi32> to vector<16x16xf32>
    %cst = arith.constant dense<0.000000e+00> : vector<16x32xf32>
    %14 = tpu.matmul %13, %1, %cst {dimension_numbers = #tpu.dot_dimension_numbers<[1], [0], [0], [1], [0, 0, 1, 1], [], []>} : vector<16x16xf32>, vector<16x32xf32>, vector<16x32xf32> -> vector<16x32xf32>
    %cst_5 = arith.constant 5.65685415 : f32
    %15 = vector.broadcast %cst_5 : f32 to vector<16x32xf32>
    %16 = arith.mulf %14, %15 : vector<16x32xf32>
    %17 = arith.addf %16, %2 : vector<16x32xf32>
    %c16 = arith.constant 16 : index
    %c0_6 = arith.constant 0 : index
    %18 = vector.load %arg2[%c16, %c0_6] : memref<392x128xf32, #tpu.memory_space<vmem>>, vector<32x128xf32>
    %19 = vector.extract_strided_slice %18 {offsets = [0, 0], sizes = [32, 96], strides = [1, 1]} : vector<32x128xf32> to vector<32x96xf32>
    %20 = vector.extract_strided_slice %18 {offsets = [0, 96], sizes = [32, 32], strides = [1, 1]} : vector<32x128xf32> to vector<32x32xf32>
    %c48 = arith.constant 48 : index
    %c0_7 = arith.constant 0 : index
    %21 = vector.load %arg2[%c48, %c0_7] : memref<392x128xf32, #tpu.memory_space<vmem>>, vector<32x128xf32>
    %c144 = arith.constant 144 : index
    %c0_8 = arith.constant 0 : index
    %22 = vector.load %arg2[%c144, %c0_8] : memref<392x128xf32, #tpu.memory_space<vmem>>, vector<128x128xf32>
    %23 = vector.extract_strided_slice %22 {offsets = [0, 0], sizes = [128, 32], strides = [1, 1]} : vector<128x128xf32> to vector<128x32xf32>
    %24 = vector.extract_strided_slice %7 {offsets = [0, 0], sizes = [1, 32], strides = [1, 1]} : vector<24x128xf32> to vector<1x32xf32>
    %25 = vector.extract_strided_slice %7 {offsets = [1, 0], sizes = [1, 32], strides = [1, 1]} : vector<24x128xf32> to vector<1x32xf32>
    %26 = vector.extract_strided_slice %7 {offsets = [2, 0], sizes = [1, 96], strides = [1, 1]} : vector<24x128xf32> to vector<1x96xf32>
    %27 = vector.extract_strided_slice %7 {offsets = [3, 0], sizes = [1, 32], strides = [1, 1]} : vector<24x128xf32> to vector<1x32xf32>
    %28 = vector.extract_strided_slice %7 {offsets = [4, 0], sizes = [1, 32], strides = [1, 1]} : vector<24x128xf32> to vector<1x32xf32>
    %29 = vector.extract_strided_slice %7 {offsets = [5, 0], sizes = [1, 32], strides = [1, 1]} : vector<24x128xf32> to vector<1x32xf32>
    %30 = vector.extract_strided_slice %7 {offsets = [6, 0], sizes = [1, 128], strides = [1, 1]} : vector<24x128xf32> to vector<1x128xf32>
    %31 = vector.extract_strided_slice %7 {offsets = [7, 0], sizes = [1, 32], strides = [1, 1]} : vector<24x128xf32> to vector<1x32xf32>
    %cst_9 = arith.constant dense<0.000000e+00> : vector<16xf32>
    %32 = vector.multi_reduction <add>, %17, %cst_9 [1] : vector<16x32xf32> to vector<16xf32>
    %33 = vector.shape_cast %32 : vector<16xf32> to vector<16x1xf32>
    %cst_10 = arith.constant 3.200000e+01 : f32
    %34 = vector.broadcast %cst_10 : f32 to vector<16x1xf32>
    %35 = arith.divf %33, %34 : vector<16x1xf32>
    %36 = vector.broadcast %35 : vector<16x1xf32> to vector<16x32xf32>
    %37 = arith.subf %17, %36 : vector<16x32xf32>
    %38 = arith.mulf %37, %37 : vector<16x32xf32>
    %cst_11 = arith.constant dense<0.000000e+00> : vector<16xf32>
    %39 = vector.multi_reduction <add>, %38, %cst_11 [1] : vector<16x32xf32> to vector<16xf32>
    %40 = vector.shape_cast %39 : vector<16xf32> to vector<16x1xf32>
    %cst_12 = arith.constant 3.200000e+01 : f32
    %41 = vector.broadcast %cst_12 : f32 to vector<16x1xf32>
    %42 = arith.divf %40, %41 : vector<16x1xf32>
    %43 = vector.broadcast %35 : vector<16x1xf32> to vector<16x32xf32>
    %44 = arith.subf %17, %43 : vector<16x32xf32>
    %cst_13 = arith.constant 9.99999974E-6 : f32
    %45 = vector.broadcast %cst_13 : f32 to vector<16x1xf32>
    %46 = arith.addf %42, %45 : vector<16x1xf32>
    %47 = math.rsqrt %46 : vector<16x1xf32>
    %48 = vector.broadcast %47 : vector<16x1xf32> to vector<16x32xf32>
    %49 = arith.mulf %44, %48 : vector<16x32xf32>
    %50 = vector.broadcast %24 : vector<1x32xf32> to vector<16x32xf32>
    %51 = arith.mulf %49, %50 : vector<16x32xf32>
    %52 = vector.broadcast %25 : vector<1x32xf32> to vector<16x32xf32>
    %53 = arith.addf %51, %52 : vector<16x32xf32>
    %cst_14 = arith.constant dense<0.000000e+00> : vector<16x96xf32>
    %54 = tpu.matmul %53, %19, %cst_14 {dimension_numbers = #tpu.dot_dimension_numbers<[1], [0], [0], [1], [0, 0, 1, 1], [], []>} : vector<16x32xf32>, vector<32x96xf32>, vector<16x96xf32> -> vector<16x96xf32>
    %55 = vector.broadcast %26 : vector<1x96xf32> to vector<16x96xf32>
    %56 = arith.addf %54, %55 : vector<16x96xf32>
    %57 = vector.extract_strided_slice %56 {offsets = [0, 0], sizes = [16, 32], strides = [1, 1]} : vector<16x96xf32> to vector<16x32xf32>
    %cst_15 = arith.constant 0.353553385 : f32
    %58 = vector.broadcast %cst_15 : f32 to vector<16x32xf32>
    %59 = arith.mulf %57, %58 : vector<16x32xf32>
    %60 = vector.extract_strided_slice %56 {offsets = [0, 32], sizes = [16, 32], strides = [1, 1]} : vector<16x96xf32> to vector<16x32xf32>
    %61 = vector.extract_strided_slice %56 {offsets = [0, 64], sizes = [16, 32], strides = [1, 1]} : vector<16x96xf32> to vector<16x32xf32>
    %cst_16 = arith.constant dense<0.000000e+00> : vector<64x32xf32>
    %62 = tpu.matmul %4, %59, %cst_16 {dimension_numbers = #tpu.dot_dimension_numbers<[1], [0], [0], [1], [0, 0, 1, 1], [], []>} : vector<64x16xf32>, vector<16x32xf32>, vector<64x32xf32> -> vector<64x32xf32>
    %63 = arith.mulf %62, %6 : vector<64x32xf32>
    %64 = tpu.transpose %60, [1, 0] : vector<16x32xf32> -> vector<32x16xf32>
    %cst_17 = arith.constant dense<0.000000e+00> : vector<64x16xf32>
    %65 = tpu.matmul %63, %64, %cst_17 {dimension_numbers = #tpu.dot_dimension_numbers<[1], [0], [0], [1], [0, 0, 1, 1], [], []>} : vector<64x32xf32>, vector<32x16xf32>, vector<64x16xf32> -> vector<64x16xf32>
    %66 = arith.addf %65, %5 : vector<64x16xf32>
    %cst_18 = arith.constant dense<0xFF800000> : vector<64xf32>
    %67 = vector.multi_reduction <maximumf>, %66, %cst_18 [1] : vector<64x16xf32> to vector<64xf32>
    %68 = vector.shape_cast %67 : vector<64xf32> to vector<64x1xf32>
    %69 = vector.broadcast %68 : vector<64x1xf32> to vector<64x16xf32>
    %70 = arith.subf %66, %69 : vector<64x16xf32>
    %71 = math.exp %70 : vector<64x16xf32>
    %cst_19 = arith.constant dense<0.000000e+00> : vector<64xf32>
    %72 = vector.multi_reduction <add>, %71, %cst_19 [1] : vector<64x16xf32> to vector<64xf32>
    %73 = vector.shape_cast %72 : vector<64xf32> to vector<64x1xf32>
    %74 = tpu.reciprocal %73 {approx = true} : vector<64x1xf32> -> vector<64x1xf32>
    %75 = vector.broadcast %74 : vector<64x1xf32> to vector<64x16xf32>
    %76 = arith.mulf %71, %75 : vector<64x16xf32>
    %cst_20 = arith.constant dense<0.000000e+00> : vector<64x32xf32>
    %77 = tpu.matmul %76, %61, %cst_20 {dimension_numbers = #tpu.dot_dimension_numbers<[1], [0], [0], [1], [0, 0, 1, 1], [], []>} : vector<64x16xf32>, vector<16x32xf32>, vector<64x32xf32> -> vector<64x32xf32>
    %78 = arith.mulf %77, %6 : vector<64x32xf32>
    %79 = vector.extract_strided_slice %78 {offsets = [0, 0], sizes = [16, 32], strides = [1, 1]} : vector<64x32xf32> to vector<16x32xf32>
    %80 = vector.extract_strided_slice %78 {offsets = [16, 0], sizes = [16, 32], strides = [1, 1]} : vector<64x32xf32> to vector<16x32xf32>
    %81 = arith.addf %79, %80 : vector<16x32xf32>
    %82 = vector.extract_strided_slice %78 {offsets = [32, 0], sizes = [16, 32], strides = [1, 1]} : vector<64x32xf32> to vector<16x32xf32>
    %83 = arith.addf %81, %82 : vector<16x32xf32>
    %84 = vector.extract_strided_slice %78 {offsets = [48, 0], sizes = [16, 32], strides = [1, 1]} : vector<64x32xf32> to vector<16x32xf32>
    %85 = arith.addf %83, %84 : vector<16x32xf32>
    %cst_21 = arith.constant dense<0.000000e+00> : vector<16x32xf32>
    %86 = tpu.matmul %85, %20, %cst_21 {dimension_numbers = #tpu.dot_dimension_numbers<[1], [0], [0], [1], [0, 0, 1, 1], [], []>} : vector<16x32xf32>, vector<32x32xf32>, vector<16x32xf32> -> vector<16x32xf32>
    %87 = arith.addf %17, %86 : vector<16x32xf32>
    %88 = vector.broadcast %27 : vector<1x32xf32> to vector<16x32xf32>
    %89 = arith.addf %87, %88 : vector<16x32xf32>
    %cst_22 = arith.constant dense<0.000000e+00> : vector<16xf32>
    %90 = vector.multi_reduction <add>, %89, %cst_22 [1] : vector<16x32xf32> to vector<16xf32>
    %91 = vector.shape_cast %90 : vector<16xf32> to vector<16x1xf32>
    %cst_23 = arith.constant 3.200000e+01 : f32
    %92 = vector.broadcast %cst_23 : f32 to vector<16x1xf32>
    %93 = arith.divf %91, %92 : vector<16x1xf32>
    %94 = vector.broadcast %93 : vector<16x1xf32> to vector<16x32xf32>
    %95 = arith.subf %89, %94 : vector<16x32xf32>
    %96 = arith.mulf %95, %95 : vector<16x32xf32>
    %cst_24 = arith.constant dense<0.000000e+00> : vector<16xf32>
    %97 = vector.multi_reduction <add>, %96, %cst_24 [1] : vector<16x32xf32> to vector<16xf32>
    %98 = vector.shape_cast %97 : vector<16xf32> to vector<16x1xf32>
    %cst_25 = arith.constant 3.200000e+01 : f32
    %99 = vector.broadcast %cst_25 : f32 to vector<16x1xf32>
    %100 = arith.divf %98, %99 : vector<16x1xf32>
    %101 = vector.broadcast %93 : vector<16x1xf32> to vector<16x32xf32>
    %102 = arith.subf %89, %101 : vector<16x32xf32>
    %cst_26 = arith.constant 9.99999974E-6 : f32
    %103 = vector.broadcast %cst_26 : f32 to vector<16x1xf32>
    %104 = arith.addf %100, %103 : vector<16x1xf32>
    %105 = math.rsqrt %104 : vector<16x1xf32>
    %106 = vector.broadcast %105 : vector<16x1xf32> to vector<16x32xf32>
    %107 = arith.mulf %102, %106 : vector<16x32xf32>
    %108 = vector.broadcast %28 : vector<1x32xf32> to vector<16x32xf32>
    %109 = arith.mulf %107, %108 : vector<16x32xf32>
    %110 = vector.broadcast %29 : vector<1x32xf32> to vector<16x32xf32>
    %111 = arith.addf %109, %110 : vector<16x32xf32>
    %cst_27 = arith.constant dense<0.000000e+00> : vector<16x128xf32>
    %112 = tpu.matmul %111, %21, %cst_27 {dimension_numbers = #tpu.dot_dimension_numbers<[1], [0], [0], [1], [0, 0, 1, 1], [], []>} : vector<16x32xf32>, vector<32x128xf32>, vector<16x128xf32> -> vector<16x128xf32>
    %113 = vector.broadcast %30 : vector<1x128xf32> to vector<16x128xf32>
    %114 = arith.addf %112, %113 : vector<16x128xf32>
    %cst_28 = arith.constant 5.000000e-01 : f32
    %115 = vector.broadcast %cst_28 : f32 to vector<16x128xf32>
    %116 = arith.mulf %115, %114 : vector<16x128xf32>
    %cst_29 = arith.constant 0.707106769 : f32
    %117 = vector.broadcast %cst_29 : f32 to vector<16x128xf32>
    %118 = arith.mulf %114, %117 : vector<16x128xf32>
    %cst_30 = arith.constant 0.000000e+00 : f32
    %119 = vector.broadcast %cst_30 : f32 to vector<16x128xf32>
    %120 = arith.subf %119, %118 : vector<16x128xf32>
    %121 = arith.maximumf %118, %120 : vector<16x128xf32>
    %cst_31 = arith.constant 0.327591091 : f32
    %122 = vector.broadcast %cst_31 : f32 to vector<16x128xf32>
    %123 = arith.mulf %122, %121 : vector<16x128xf32>
    %cst_32 = arith.constant 1.000000e+00 : f32
    %124 = vector.broadcast %cst_32 : f32 to vector<16x128xf32>
    %125 = arith.addf %124, %123 : vector<16x128xf32>
    %cst_33 = arith.constant 1.000000e+00 : f32
    %126 = vector.broadcast %cst_33 : f32 to vector<16x128xf32>
    %127 = arith.divf %126, %125 : vector<16x128xf32>
    %cst_34 = arith.constant 1.06140542 : f32
    %128 = vector.broadcast %cst_34 : f32 to vector<16x128xf32>
    %129 = arith.mulf %127, %128 : vector<16x128xf32>
    %cst_35 = arith.constant -1.45315206 : f32
    %130 = vector.broadcast %cst_35 : f32 to vector<16x128xf32>
    %131 = arith.addf %130, %129 : vector<16x128xf32>
    %132 = arith.mulf %127, %131 : vector<16x128xf32>
    %cst_36 = arith.constant 1.42141378 : f32
    %133 = vector.broadcast %cst_36 : f32 to vector<16x128xf32>
    %134 = arith.addf %133, %132 : vector<16x128xf32>
    %135 = arith.mulf %127, %134 : vector<16x128xf32>
    %cst_37 = arith.constant -0.284496725 : f32
    %136 = vector.broadcast %cst_37 : f32 to vector<16x128xf32>
    %137 = arith.addf %136, %135 : vector<16x128xf32>
    %138 = arith.mulf %127, %137 : vector<16x128xf32>
    %cst_38 = arith.constant 0.254829586 : f32
    %139 = vector.broadcast %cst_38 : f32 to vector<16x128xf32>
    %140 = arith.addf %139, %138 : vector<16x128xf32>
    %141 = arith.mulf %127, %140 : vector<16x128xf32>
    %cst_39 = arith.constant 0.000000e+00 : f32
    %142 = vector.broadcast %cst_39 : f32 to vector<16x128xf32>
    %143 = arith.subf %142, %121 : vector<16x128xf32>
    %144 = arith.mulf %143, %121 : vector<16x128xf32>
    %145 = math.exp %144 : vector<16x128xf32>
    %146 = arith.mulf %141, %145 : vector<16x128xf32>
    %cst_40 = arith.constant 1.000000e+00 : f32
    %147 = vector.broadcast %cst_40 : f32 to vector<16x128xf32>
    %148 = arith.subf %147, %146 : vector<16x128xf32>
    %cst_41 = arith.constant 0.000000e+00 : f32
    %149 = vector.broadcast %cst_41 : f32 to vector<16x128xf32>
    %150 = arith.cmpf olt, %118, %149 : vector<16x128xf32>
    %cst_42 = arith.constant 0.000000e+00 : f32
    %151 = vector.broadcast %cst_42 : f32 to vector<16x128xf32>
    %152 = arith.subf %151, %148 : vector<16x128xf32>
    %153 = arith.select %150, %152, %148 : vector<16x128xi1>, vector<16x128xf32>
    %cst_43 = arith.constant 1.000000e+00 : f32
    %154 = vector.broadcast %cst_43 : f32 to vector<16x128xf32>
    %155 = arith.addf %154, %153 : vector<16x128xf32>
    %156 = arith.mulf %116, %155 : vector<16x128xf32>
    %cst_44 = arith.constant dense<0.000000e+00> : vector<16x32xf32>
    %157 = tpu.matmul %156, %23, %cst_44 {dimension_numbers = #tpu.dot_dimension_numbers<[1], [0], [0], [1], [0, 0, 1, 1], [], []>} : vector<16x128xf32>, vector<128x32xf32>, vector<16x32xf32> -> vector<16x32xf32>
    %158 = arith.addf %89, %157 : vector<16x32xf32>
    %159 = vector.broadcast %31 : vector<1x32xf32> to vector<16x32xf32>
    %160 = arith.addf %158, %159 : vector<16x32xf32>
    %c80 = arith.constant 80 : index
    %c0_45 = arith.constant 0 : index
    %161 = vector.load %arg2[%c80, %c0_45] : memref<392x128xf32, #tpu.memory_space<vmem>>, vector<32x128xf32>
    %162 = vector.extract_strided_slice %161 {offsets = [0, 0], sizes = [32, 96], strides = [1, 1]} : vector<32x128xf32> to vector<32x96xf32>
    %163 = vector.extract_strided_slice %161 {offsets = [0, 96], sizes = [32, 32], strides = [1, 1]} : vector<32x128xf32> to vector<32x32xf32>
    %c112 = arith.constant 112 : index
    %c0_46 = arith.constant 0 : index
    %164 = vector.load %arg2[%c112, %c0_46] : memref<392x128xf32, #tpu.memory_space<vmem>>, vector<32x128xf32>
    %c144_47 = arith.constant 144 : index
    %c0_48 = arith.constant 0 : index
    %165 = vector.load %arg2[%c144_47, %c0_48] : memref<392x128xf32, #tpu.memory_space<vmem>>, vector<128x128xf32>
    %166 = vector.extract_strided_slice %165 {offsets = [0, 32], sizes = [128, 32], strides = [1, 1]} : vector<128x128xf32> to vector<128x32xf32>
    %167 = vector.extract_strided_slice %7 {offsets = [8, 0], sizes = [1, 32], strides = [1, 1]} : vector<24x128xf32> to vector<1x32xf32>
    %168 = vector.extract_strided_slice %7 {offsets = [9, 0], sizes = [1, 32], strides = [1, 1]} : vector<24x128xf32> to vector<1x32xf32>
    %169 = vector.extract_strided_slice %7 {offsets = [10, 0], sizes = [1, 96], strides = [1, 1]} : vector<24x128xf32> to vector<1x96xf32>
    %170 = vector.extract_strided_slice %7 {offsets = [11, 0], sizes = [1, 32], strides = [1, 1]} : vector<24x128xf32> to vector<1x32xf32>
    %171 = vector.extract_strided_slice %7 {offsets = [12, 0], sizes = [1, 32], strides = [1, 1]} : vector<24x128xf32> to vector<1x32xf32>
    %172 = vector.extract_strided_slice %7 {offsets = [13, 0], sizes = [1, 32], strides = [1, 1]} : vector<24x128xf32> to vector<1x32xf32>
    %173 = vector.extract_strided_slice %7 {offsets = [14, 0], sizes = [1, 128], strides = [1, 1]} : vector<24x128xf32> to vector<1x128xf32>
    %174 = vector.extract_strided_slice %7 {offsets = [15, 0], sizes = [1, 32], strides = [1, 1]} : vector<24x128xf32> to vector<1x32xf32>
    %cst_49 = arith.constant dense<0.000000e+00> : vector<16xf32>
    %175 = vector.multi_reduction <add>, %160, %cst_49 [1] : vector<16x32xf32> to vector<16xf32>
    %176 = vector.shape_cast %175 : vector<16xf32> to vector<16x1xf32>
    %cst_50 = arith.constant 3.200000e+01 : f32
    %177 = vector.broadcast %cst_50 : f32 to vector<16x1xf32>
    %178 = arith.divf %176, %177 : vector<16x1xf32>
    %179 = vector.broadcast %178 : vector<16x1xf32> to vector<16x32xf32>
    %180 = arith.subf %160, %179 : vector<16x32xf32>
    %181 = arith.mulf %180, %180 : vector<16x32xf32>
    %cst_51 = arith.constant dense<0.000000e+00> : vector<16xf32>
    %182 = vector.multi_reduction <add>, %181, %cst_51 [1] : vector<16x32xf32> to vector<16xf32>
    %183 = vector.shape_cast %182 : vector<16xf32> to vector<16x1xf32>
    %cst_52 = arith.constant 3.200000e+01 : f32
    %184 = vector.broadcast %cst_52 : f32 to vector<16x1xf32>
    %185 = arith.divf %183, %184 : vector<16x1xf32>
    %186 = vector.broadcast %178 : vector<16x1xf32> to vector<16x32xf32>
    %187 = arith.subf %160, %186 : vector<16x32xf32>
    %cst_53 = arith.constant 9.99999974E-6 : f32
    %188 = vector.broadcast %cst_53 : f32 to vector<16x1xf32>
    %189 = arith.addf %185, %188 : vector<16x1xf32>
    %190 = math.rsqrt %189 : vector<16x1xf32>
    %191 = vector.broadcast %190 : vector<16x1xf32> to vector<16x32xf32>
    %192 = arith.mulf %187, %191 : vector<16x32xf32>
    %193 = vector.broadcast %167 : vector<1x32xf32> to vector<16x32xf32>
    %194 = arith.mulf %192, %193 : vector<16x32xf32>
    %195 = vector.broadcast %168 : vector<1x32xf32> to vector<16x32xf32>
    %196 = arith.addf %194, %195 : vector<16x32xf32>
    %cst_54 = arith.constant dense<0.000000e+00> : vector<16x96xf32>
    %197 = tpu.matmul %196, %162, %cst_54 {dimension_numbers = #tpu.dot_dimension_numbers<[1], [0], [0], [1], [0, 0, 1, 1], [], []>} : vector<16x32xf32>, vector<32x96xf32>, vector<16x96xf32> -> vector<16x96xf32>
    %198 = vector.broadcast %169 : vector<1x96xf32> to vector<16x96xf32>
    %199 = arith.addf %197, %198 : vector<16x96xf32>
    %200 = vector.extract_strided_slice %199 {offsets = [0, 0], sizes = [16, 32], strides = [1, 1]} : vector<16x96xf32> to vector<16x32xf32>
    %cst_55 = arith.constant 0.353553385 : f32
    %201 = vector.broadcast %cst_55 : f32 to vector<16x32xf32>
    %202 = arith.mulf %200, %201 : vector<16x32xf32>
    %203 = vector.extract_strided_slice %199 {offsets = [0, 32], sizes = [16, 32], strides = [1, 1]} : vector<16x96xf32> to vector<16x32xf32>
    %204 = vector.extract_strided_slice %199 {offsets = [0, 64], sizes = [16, 32], strides = [1, 1]} : vector<16x96xf32> to vector<16x32xf32>
    %cst_56 = arith.constant dense<0.000000e+00> : vector<64x32xf32>
    %205 = tpu.matmul %4, %202, %cst_56 {dimension_numbers = #tpu.dot_dimension_numbers<[1], [0], [0], [1], [0, 0, 1, 1], [], []>} : vector<64x16xf32>, vector<16x32xf32>, vector<64x32xf32> -> vector<64x32xf32>
    %206 = arith.mulf %205, %6 : vector<64x32xf32>
    %207 = tpu.transpose %203, [1, 0] : vector<16x32xf32> -> vector<32x16xf32>
    %cst_57 = arith.constant dense<0.000000e+00> : vector<64x16xf32>
    %208 = tpu.matmul %206, %207, %cst_57 {dimension_numbers = #tpu.dot_dimension_numbers<[1], [0], [0], [1], [0, 0, 1, 1], [], []>} : vector<64x32xf32>, vector<32x16xf32>, vector<64x16xf32> -> vector<64x16xf32>
    %209 = arith.addf %208, %5 : vector<64x16xf32>
    %cst_58 = arith.constant dense<0xFF800000> : vector<64xf32>
    %210 = vector.multi_reduction <maximumf>, %209, %cst_58 [1] : vector<64x16xf32> to vector<64xf32>
    %211 = vector.shape_cast %210 : vector<64xf32> to vector<64x1xf32>
    %212 = vector.broadcast %211 : vector<64x1xf32> to vector<64x16xf32>
    %213 = arith.subf %209, %212 : vector<64x16xf32>
    %214 = math.exp %213 : vector<64x16xf32>
    %cst_59 = arith.constant dense<0.000000e+00> : vector<64xf32>
    %215 = vector.multi_reduction <add>, %214, %cst_59 [1] : vector<64x16xf32> to vector<64xf32>
    %216 = vector.shape_cast %215 : vector<64xf32> to vector<64x1xf32>
    %217 = tpu.reciprocal %216 {approx = true} : vector<64x1xf32> -> vector<64x1xf32>
    %218 = vector.broadcast %217 : vector<64x1xf32> to vector<64x16xf32>
    %219 = arith.mulf %214, %218 : vector<64x16xf32>
    %cst_60 = arith.constant dense<0.000000e+00> : vector<64x32xf32>
    %220 = tpu.matmul %219, %204, %cst_60 {dimension_numbers = #tpu.dot_dimension_numbers<[1], [0], [0], [1], [0, 0, 1, 1], [], []>} : vector<64x16xf32>, vector<16x32xf32>, vector<64x32xf32> -> vector<64x32xf32>
    %221 = arith.mulf %220, %6 : vector<64x32xf32>
    %222 = vector.extract_strided_slice %221 {offsets = [0, 0], sizes = [16, 32], strides = [1, 1]} : vector<64x32xf32> to vector<16x32xf32>
    %223 = vector.extract_strided_slice %221 {offsets = [16, 0], sizes = [16, 32], strides = [1, 1]} : vector<64x32xf32> to vector<16x32xf32>
    %224 = arith.addf %222, %223 : vector<16x32xf32>
    %225 = vector.extract_strided_slice %221 {offsets = [32, 0], sizes = [16, 32], strides = [1, 1]} : vector<64x32xf32> to vector<16x32xf32>
    %226 = arith.addf %224, %225 : vector<16x32xf32>
    %227 = vector.extract_strided_slice %221 {offsets = [48, 0], sizes = [16, 32], strides = [1, 1]} : vector<64x32xf32> to vector<16x32xf32>
    %228 = arith.addf %226, %227 : vector<16x32xf32>
    %cst_61 = arith.constant dense<0.000000e+00> : vector<16x32xf32>
    %229 = tpu.matmul %228, %163, %cst_61 {dimension_numbers = #tpu.dot_dimension_numbers<[1], [0], [0], [1], [0, 0, 1, 1], [], []>} : vector<16x32xf32>, vector<32x32xf32>, vector<16x32xf32> -> vector<16x32xf32>
    %230 = arith.addf %160, %229 : vector<16x32xf32>
    %231 = vector.broadcast %170 : vector<1x32xf32> to vector<16x32xf32>
    %232 = arith.addf %230, %231 : vector<16x32xf32>
    %cst_62 = arith.constant dense<0.000000e+00> : vector<16xf32>
    %233 = vector.multi_reduction <add>, %232, %cst_62 [1] : vector<16x32xf32> to vector<16xf32>
    %234 = vector.shape_cast %233 : vector<16xf32> to vector<16x1xf32>
    %cst_63 = arith.constant 3.200000e+01 : f32
    %235 = vector.broadcast %cst_63 : f32 to vector<16x1xf32>
    %236 = arith.divf %234, %235 : vector<16x1xf32>
    %237 = vector.broadcast %236 : vector<16x1xf32> to vector<16x32xf32>
    %238 = arith.subf %232, %237 : vector<16x32xf32>
    %239 = arith.mulf %238, %238 : vector<16x32xf32>
    %cst_64 = arith.constant dense<0.000000e+00> : vector<16xf32>
    %240 = vector.multi_reduction <add>, %239, %cst_64 [1] : vector<16x32xf32> to vector<16xf32>
    %241 = vector.shape_cast %240 : vector<16xf32> to vector<16x1xf32>
    %cst_65 = arith.constant 3.200000e+01 : f32
    %242 = vector.broadcast %cst_65 : f32 to vector<16x1xf32>
    %243 = arith.divf %241, %242 : vector<16x1xf32>
    %244 = vector.broadcast %236 : vector<16x1xf32> to vector<16x32xf32>
    %245 = arith.subf %232, %244 : vector<16x32xf32>
    %cst_66 = arith.constant 9.99999974E-6 : f32
    %246 = vector.broadcast %cst_66 : f32 to vector<16x1xf32>
    %247 = arith.addf %243, %246 : vector<16x1xf32>
    %248 = math.rsqrt %247 : vector<16x1xf32>
    %249 = vector.broadcast %248 : vector<16x1xf32> to vector<16x32xf32>
    %250 = arith.mulf %245, %249 : vector<16x32xf32>
    %251 = vector.broadcast %171 : vector<1x32xf32> to vector<16x32xf32>
    %252 = arith.mulf %250, %251 : vector<16x32xf32>
    %253 = vector.broadcast %172 : vector<1x32xf32> to vector<16x32xf32>
    %254 = arith.addf %252, %253 : vector<16x32xf32>
    %cst_67 = arith.constant dense<0.000000e+00> : vector<16x128xf32>
    %255 = tpu.matmul %254, %164, %cst_67 {dimension_numbers = #tpu.dot_dimension_numbers<[1], [0], [0], [1], [0, 0, 1, 1], [], []>} : vector<16x32xf32>, vector<32x128xf32>, vector<16x128xf32> -> vector<16x128xf32>
    %256 = vector.broadcast %173 : vector<1x128xf32> to vector<16x128xf32>
    %257 = arith.addf %255, %256 : vector<16x128xf32>
    %cst_68 = arith.constant 5.000000e-01 : f32
    %258 = vector.broadcast %cst_68 : f32 to vector<16x128xf32>
    %259 = arith.mulf %258, %257 : vector<16x128xf32>
    %cst_69 = arith.constant 0.707106769 : f32
    %260 = vector.broadcast %cst_69 : f32 to vector<16x128xf32>
    %261 = arith.mulf %257, %260 : vector<16x128xf32>
    %cst_70 = arith.constant 0.000000e+00 : f32
    %262 = vector.broadcast %cst_70 : f32 to vector<16x128xf32>
    %263 = arith.subf %262, %261 : vector<16x128xf32>
    %264 = arith.maximumf %261, %263 : vector<16x128xf32>
    %cst_71 = arith.constant 0.327591091 : f32
    %265 = vector.broadcast %cst_71 : f32 to vector<16x128xf32>
    %266 = arith.mulf %265, %264 : vector<16x128xf32>
    %cst_72 = arith.constant 1.000000e+00 : f32
    %267 = vector.broadcast %cst_72 : f32 to vector<16x128xf32>
    %268 = arith.addf %267, %266 : vector<16x128xf32>
    %cst_73 = arith.constant 1.000000e+00 : f32
    %269 = vector.broadcast %cst_73 : f32 to vector<16x128xf32>
    %270 = arith.divf %269, %268 : vector<16x128xf32>
    %cst_74 = arith.constant 1.06140542 : f32
    %271 = vector.broadcast %cst_74 : f32 to vector<16x128xf32>
    %272 = arith.mulf %270, %271 : vector<16x128xf32>
    %cst_75 = arith.constant -1.45315206 : f32
    %273 = vector.broadcast %cst_75 : f32 to vector<16x128xf32>
    %274 = arith.addf %273, %272 : vector<16x128xf32>
    %275 = arith.mulf %270, %274 : vector<16x128xf32>
    %cst_76 = arith.constant 1.42141378 : f32
    %276 = vector.broadcast %cst_76 : f32 to vector<16x128xf32>
    %277 = arith.addf %276, %275 : vector<16x128xf32>
    %278 = arith.mulf %270, %277 : vector<16x128xf32>
    %cst_77 = arith.constant -0.284496725 : f32
    %279 = vector.broadcast %cst_77 : f32 to vector<16x128xf32>
    %280 = arith.addf %279, %278 : vector<16x128xf32>
    %281 = arith.mulf %270, %280 : vector<16x128xf32>
    %cst_78 = arith.constant 0.254829586 : f32
    %282 = vector.broadcast %cst_78 : f32 to vector<16x128xf32>
    %283 = arith.addf %282, %281 : vector<16x128xf32>
    %284 = arith.mulf %270, %283 : vector<16x128xf32>
    %cst_79 = arith.constant 0.000000e+00 : f32
    %285 = vector.broadcast %cst_79 : f32 to vector<16x128xf32>
    %286 = arith.subf %285, %264 : vector<16x128xf32>
    %287 = arith.mulf %286, %264 : vector<16x128xf32>
    %288 = math.exp %287 : vector<16x128xf32>
    %289 = arith.mulf %284, %288 : vector<16x128xf32>
    %cst_80 = arith.constant 1.000000e+00 : f32
    %290 = vector.broadcast %cst_80 : f32 to vector<16x128xf32>
    %291 = arith.subf %290, %289 : vector<16x128xf32>
    %cst_81 = arith.constant 0.000000e+00 : f32
    %292 = vector.broadcast %cst_81 : f32 to vector<16x128xf32>
    %293 = arith.cmpf olt, %261, %292 : vector<16x128xf32>
    %cst_82 = arith.constant 0.000000e+00 : f32
    %294 = vector.broadcast %cst_82 : f32 to vector<16x128xf32>
    %295 = arith.subf %294, %291 : vector<16x128xf32>
    %296 = arith.select %293, %295, %291 : vector<16x128xi1>, vector<16x128xf32>
    %cst_83 = arith.constant 1.000000e+00 : f32
    %297 = vector.broadcast %cst_83 : f32 to vector<16x128xf32>
    %298 = arith.addf %297, %296 : vector<16x128xf32>
    %299 = arith.mulf %259, %298 : vector<16x128xf32>
    %cst_84 = arith.constant dense<0.000000e+00> : vector<16x32xf32>
    %300 = tpu.matmul %299, %166, %cst_84 {dimension_numbers = #tpu.dot_dimension_numbers<[1], [0], [0], [1], [0, 0, 1, 1], [], []>} : vector<16x128xf32>, vector<128x32xf32>, vector<16x32xf32> -> vector<16x32xf32>
    %301 = arith.addf %232, %300 : vector<16x32xf32>
    %302 = vector.broadcast %174 : vector<1x32xf32> to vector<16x32xf32>
    %303 = arith.addf %301, %302 : vector<16x32xf32>
    %304 = vector.extract_strided_slice %7 {offsets = [16, 0], sizes = [1, 32], strides = [1, 1]} : vector<24x128xf32> to vector<1x32xf32>
    %305 = vector.extract_strided_slice %7 {offsets = [17, 0], sizes = [1, 32], strides = [1, 1]} : vector<24x128xf32> to vector<1x32xf32>
    %cst_85 = arith.constant dense<0.000000e+00> : vector<16xf32>
    %306 = vector.multi_reduction <add>, %303, %cst_85 [1] : vector<16x32xf32> to vector<16xf32>
    %307 = vector.shape_cast %306 : vector<16xf32> to vector<16x1xf32>
    %cst_86 = arith.constant 3.200000e+01 : f32
    %308 = vector.broadcast %cst_86 : f32 to vector<16x1xf32>
    %309 = arith.divf %307, %308 : vector<16x1xf32>
    %310 = vector.broadcast %309 : vector<16x1xf32> to vector<16x32xf32>
    %311 = arith.subf %303, %310 : vector<16x32xf32>
    %312 = arith.mulf %311, %311 : vector<16x32xf32>
    %cst_87 = arith.constant dense<0.000000e+00> : vector<16xf32>
    %313 = vector.multi_reduction <add>, %312, %cst_87 [1] : vector<16x32xf32> to vector<16xf32>
    %314 = vector.shape_cast %313 : vector<16xf32> to vector<16x1xf32>
    %cst_88 = arith.constant 3.200000e+01 : f32
    %315 = vector.broadcast %cst_88 : f32 to vector<16x1xf32>
    %316 = arith.divf %314, %315 : vector<16x1xf32>
    %317 = vector.broadcast %309 : vector<16x1xf32> to vector<16x32xf32>
    %318 = arith.subf %303, %317 : vector<16x32xf32>
    %cst_89 = arith.constant 9.99999974E-6 : f32
    %319 = vector.broadcast %cst_89 : f32 to vector<16x1xf32>
    %320 = arith.addf %316, %319 : vector<16x1xf32>
    %321 = math.rsqrt %320 : vector<16x1xf32>
    %322 = vector.broadcast %321 : vector<16x1xf32> to vector<16x32xf32>
    %323 = arith.mulf %318, %322 : vector<16x32xf32>
    %324 = vector.broadcast %304 : vector<1x32xf32> to vector<16x32xf32>
    %325 = arith.mulf %323, %324 : vector<16x32xf32>
    %326 = vector.broadcast %305 : vector<1x32xf32> to vector<16x32xf32>
    %327 = arith.addf %325, %326 : vector<16x32xf32>
    %328 = vector.extract_strided_slice %7 {offsets = [18, 0], sizes = [1, 128], strides = [1, 1]} : vector<24x128xf32> to vector<1x128xf32>
    %c336 = arith.constant 336 : index
    %c0_90 = arith.constant 0 : index
    %329 = vector.load %arg2[%c336, %c0_90] : memref<392x128xf32, #tpu.memory_space<vmem>>, vector<32x128xf32>
    %cst_91 = arith.constant dense<0.000000e+00> : vector<16x128xf32>
    %330 = tpu.matmul %327, %329, %cst_91 {dimension_numbers = #tpu.dot_dimension_numbers<[1], [0], [0], [1], [0, 0, 1, 1], [], []>} : vector<16x32xf32>, vector<32x128xf32>, vector<16x128xf32> -> vector<16x128xf32>
    %331 = vector.broadcast %328 : vector<1x128xf32> to vector<16x128xf32>
    %332 = arith.addf %330, %331 : vector<16x128xf32>
    %c0_92 = arith.constant 0 : index
    %c0_93 = arith.constant 0 : index
    %333 = vector.load %arg3[%c0_92, %c0_93] : memref<16x128xf32, #tpu.memory_space<vmem>>, vector<16x128xf32>
    tpu.vector_store %arg3[%c0_92, %c0_93], %332 {strides = array<i32>} : memref<16x128xf32, #tpu.memory_space<vmem>>, vector<16x128xf32>,
    return
  }
  func.func @transform_0(%arg0: i32) -> (i32, i32) {
    %c0_i32 = arith.constant 0 : i32
    %c0_i32_0 = arith.constant 0 : i32
    %c0_i32_1 = arith.constant 0 : i32
    return %c0_i32, %c0_i32_0 : i32, i32
  }
  func.func @transform_1(%arg0: i32) -> (i32, i32) {
    %c0_i32 = arith.constant 0 : i32
    %c0_i32_0 = arith.constant 0 : i32
    %c0_i32_1 = arith.constant 0 : i32
    return %c0_i32, %c0_i32_0 : i32, i32
  }
  func.func @transform_2(%arg0: i32) -> (i32, i32) {
    %c0_i32 = arith.constant 0 : i32
    %c0_i32_0 = arith.constant 0 : i32
    %c0_i32_1 = arith.constant 0 : i32
    return %c0_i32, %c0_i32_0 : i32, i32
  }
}

</mosaic_0001>

<bundles_post_ra>
// kernel: tpu_custom_call.1
= control target key start
LH: loop header
LB: loop body
LE: loop exit
PB: predicated region body
PF: predicated region fallthrough
CT: control target
= control target key end

     0   :  { %7 = vsyncpa [#allocation3], 0  ;;  %s3845_s0 = inlined_call_operand.vmem [shape: s32[16,1], index: 0, kind: input, shape index: {}]   ;;  %s3846_s1 = inlined_call_operand.hbm [shape: f32[392,128], index: 1, kind: input, shape index: {}]   ;;  %s3847_s2 = inlined_call_operand.hbm [shape: f32[16,128], index: 2, kind: output, shape index: {}]  }
   0x1   :  { %8 = vsyncpa [#allocation4], 0  ;;  %s3280_s9 = smov [#allocation2]   ;;  %s3232_s13 = scalar_lea.hbm %s3846_s1, 6272 }
   0x2   :  { %s16_s10 = sshll.u32 %s3280_s9, 4  ;;  %p3233_p0 = scmp.ne.s32.totalorder %s3846_s1, %s3232_s13  ;;  %s17_s10 = int_to_ptr.vmem [resolvable:$true] %s16_s10 }
   0x3   :  { %p3236_p1 = scmp.lt.u32.totalorder %s3232_s13, %s3846_s1 }
   0x5   :  { %p3238_p2 = pnand %p3236_p1, %p3233_p0 }
   0x7   :  { %3241 = shalt.err (!%p3238_p2)
}
   0x8   :  { %s3242_s18 = scalar_lea.vmem %s17_s10, 6272  ;;  %p3247_p4 = scmp.lt.s32.totalorder %s17_s10, %s17_s10 }
   0x9   :  { %p3243_p3 = scmp.ne.s32.totalorder %s17_s10, %s3242_s18  ;;  %p3248_p5 = scmp.lt.s32.totalorder %s3242_s18, %s3242_s18 }
   0xb   :  { %p3249_p6 = por %p3248_p5, %p3247_p4 }
   0xd   :  { %p3250_p7 = pnand %p3249_p6, %p3243_p3 }
   0xf   :  { %3253 = shalt.err (!%p3250_p7)
}
  0x10   :  { %s3281_s19 = smov 128   ;;  %s3282_s20 = smov 8  }
  0x11   :  { %22 = dma.hbm_to_vmem [thread:$0]  %s3846_s1, 6272, %s17_s10, [#allocation3], %s3281_s19, %s3281_s19, %s3282_s20  }
  0x12   :  { %3276 = dma.done.wait [#allocation3], 6272  }
  0x13   :  { %3277 = vsyncadd [#allocation3], 4294961024  ;;  %v3283_v0 = vmov 0   ;;  %v39_v1 = vld [vmem:[%s3845_s0] sm:$0xff]  ;;  %v27_v3 = vld [vmem:[#allocation2 + $0x8] sm:$0xff]  ;;  %s3284_s1 = smov 96   ;;  %v41_v6 = vlaneseq }
  0x14   :  { %3051 = vset.pattern.permute.xlu0 %v3283_v0  ;;  %v26_v2 = vld [vmem:[#allocation2] sm:$0xff]  ;;  %v40_v4 = vld [vmem:[%s3845_s0 + $0x8] sm:$0xff]  ;;  %vm55_vm0 = vcmask 130048   ;;  %v3285_v9 = vmov 0.0   ;;  %vm173_vm3 = vcmask 261120   ;;  %v3342_v33 = vld [vmem:[#allocation2 + $0x10] sm:$0xff] }
  0x15   :  { %44 = vperm.xlu0 %3051, %v39_v1   ;;  %v2889_v5 = vpack.c.bf16 %v27_v3, %v26_v2  ;;  %141 = vrot.lane.b32.xlu1 %v26_v2, %s3284_s1  ;;  %v42_v7 = vand.u32 127, %v41_v6  ;;  %v3344_v34 = vld [vmem:[#allocation2 + $0x18] sm:$0xff]  ;;  %v3346_v35 = vld [vmem:[#allocation2 + $0x20] sm:$0xff]  ;;  %v3352_v38 = vld [vmem:[#allocation2 + $0x28] sm:$0xff]  ;;  %v3356_v45 = vshrl.u32 %v41_v6, 7  ;;  %s3286_s0 = smov 112  }
  0x16   :  { %v3062_v36 = vpack.i.bf16 %v3344_v34, %v3342_v33  ;;  %v2893_v37 = vpack.c.bf16 %v3344_v34, %v3342_v33  ;;  %v2897_v39 = vpack.c.bf16 %v3352_v38, %v3346_v35  ;;  %v3361_v48 = vld [vmem:[#allocation2 + $0x170] sm:$0xff]  ;;  %v3378_v61 = vld [vmem:[#allocation2 + $0x128] sm:$0xff]  ;;  %v3382_v62 = vld [vmem:[#allocation2 + $0x138] sm:$0xff]  ;;  %s3287_s27 = smov 64   ;;  %s3288_s28 = smov 32  }
  0x17   :  { %2890 = vmatprep.subr.bf16.mxu0 %v2889_v5  ;;  %v3359_v47 = vsub.s32 0, %v3356_v45  ;;  %v3364_v49 = vsub.s32 1, %v3356_v45  ;;  %v3372_v60 = vld [vmem:[#allocation2 + $0x110] sm:$0xff]  ;;  %v3386_v63 = vld [vmem:[#allocation2 + $0x148] sm:$0xff]  ;;  %v3391_v0 = vsub.s32 2, %v3356_v45  ;;  %vm3437_vm4 = vmpackc.low %vm173_vm3, %vm173_vm3  ;;  %s3289_s29 = smov [#allocation5]  }
  0x18   :  { %2892 = vmatpush3.bf16.msra.mxu0 %v2889_v5  ;;  %2894 = vmatprep.subr.bf16.mxu1 %v2893_v37  ;;  %s2415_s30 = sshll.u32 %s3289_s29, 4  ;;  %s2416_s30 = int_to_ptr.vmem [resolvable:$true] %s2415_s30 }
  0x19   :  { %47 = vperm.xlu0 %3051, %v40_v4   ;;  %143 = vrot.lane.b32.xlu1 %v27_v3, %s3284_s1  ;;  %v204_v50 = vrot.slane %v3361_v48, %v3359_v47  ;;  %v210_v53 = vrot.slane %v3361_v48, %v3364_v49  ;;  %v216_v1 = vrot.slane %v3361_v48, %v3391_v0  ;;  %s3254_s3 = scalar_lea.vmem %s2416_s30, 256  ;;  %p3259_p9 = scmp.lt.s32.totalorder %s2416_s30, %s2416_s30 }
  0x1a   :  { %2896 = vmatpush3.bf16.msra.mxu1 %v2893_v37  ;;  %p3255_p8 = scmp.ne.s32.totalorder %s2416_s30, %s3254_s3  ;;  %p3260_p10 = scmp.lt.s32.totalorder %s3254_s3, %s3254_s3 }
  0x1b   :  { %2898 = vmatprep.subr.bf16.mxu1 %v2897_v39 }
  0x1c   :  { %p3261_p11 = por %p3260_p10, %p3259_p9 }
  0x1e   :  { %2900 = vmatpush3.bf16.msra.mxu1 %v2897_v39  ;;  %p3262_p12 = pnand %p3261_p11, %p3255_p8 }
  0x87   :  { %v142_v13 = vpop.permute.xlu1 %141 }
  0x8b   :  { %v144_v15 = vpop.permute.xlu1 %143 }
  0x94   :  { %v45_v8 = vpop.permute.xlu0 %44 }
  0x95   :  { %vm49_vm1 = vcmp.eq.s32.totalorder %v45_v8, %v42_v7 }
  0x96   :  { %v2427_v10 = vsel %vm49_vm1, 1.0, %v3285_v9 }
  0x97   :  { %2643 = vmatprep.mubr.msk.f32.mxu0 %vm55_vm0, %v2427_v10  ;;  %v3399_v10 = vld [vmem:[#allocation2 + $0x118] sm:$0xff] }
  0x98   :  { %v48_v11 = vpop.permute.xlu0 %47 }
  0x99   :  { %vm50_vm2 = vcmp.eq.s32.totalorder %v48_v11, %v42_v7  ;;  %v3401_v11 = vld [vmem:[#allocation2 + $0x120] sm:$0xff] }
  0x9a   :  { %v2428_v12 = vsel %vm50_vm2, 1.0, %v3285_v9 }
  0x9b   :  { %2644 = vmatmul.mubr.msk.f32.vlgmr.msra.gmra.mrb[0].mxu0 %vm55_vm0, %v2428_v12  ;;  %v3409_v12 = vld [vmem:[#allocation2 + $0x130] sm:$0xff] }
  0x9c   :  { %2661 = vmatprep.mubr.msk.f32.mxu0 %vm55_vm0, %v3372_v60 }
 0x16e   :  { %v2645_v14 = vpop.f32.mrb[0].mxu0 }
 0x16f   :  { %v138_v16 = vmul.f32 5.656854, %v2645_v14  ;;  %v128_v17 = vpop.f32.mrb[1].mxu0 }
 0x170   :  { %v137_v18 = vmul.f32 5.656854, %v128_v17 }
 0x171   :  { %v3330_v19 = vadd.f32 %v144_v15, %v138_v16 }
 0x172   :  { %v3332_v20 = vadd.f32 %v142_v13, %v137_v18  ;;  %v3417_v13 = vld [vmem:[#allocation2 + $0x140] sm:$0xff] }
 0x173   :  { %v177_v21 = vsel %vm173_vm3, %v3330_v19, 0.0 }
 0x174   :  { %178 = vadd.xlane.f32.xlu1 %v177_v21  ;;  %v174_v22 = vsel %vm173_vm3, %v3332_v20, 0.0 }
 0x175   :  { %175 = vadd.xlane.f32.xlu0 %v174_v22 }
 0x201   :  { %v179_v23 = vpop.xlane.xlu1 %178 }
 0x202   :  { %v182_v24 = vmul.f32 0.03125, %v179_v23  ;;  %v176_v25 = vpop.xlane.xlu0 %175 }
 0x203   :  { %v181_v26 = vmul.f32 0.03125, %v176_v25 }
 0x204   :  { %v184_v27 = vsub.f32 %v3330_v19, %v182_v24 }
 0x205   :  { %v183_v28 = vsub.f32 %v3332_v20, %v181_v26 }
 0x206   :  { %v186_v31 = vmul.f32 %v184_v27, %v184_v27 }
 0x207   :  { %v185_v29 = vmul.f32 %v183_v28, %v183_v28 }
 0x208   :  { %v190_v32 = vsel %vm173_vm3, %v186_v31, 0.0 }
 0x209   :  { %v187_v30 = vsel %vm173_vm3, %v185_v29, 0.0 }
 0x20a   :  { %188 = vadd.xlane.f32.xlu0 %v187_v30 }
 0x20e   :  { %191 = vadd.xlane.f32.xlu0 %v190_v32 }
 0x224   :  { %429 = vrot.lane.b32.xlu0 %v3372_v60, %s3284_s1 }
 0x228   :  { %435 = vrot.lane.b32.xlu0 %v3378_v61, %s3284_s1 }
 0x22c   :  { %439 = vrot.lane.b32.xlu0 %v3382_v62, %s3284_s1 }
 0x230   :  { %443 = vrot.lane.b32.xlu0 %v3386_v63, %s3284_s1 }
 0x234   :  { %469 = vrot.lane.b32.xlu0 %v3399_v10, %s3286_s0 }
 0x238   :  { %473 = vrot.lane.b32.xlu0 %v3378_v61, %s3286_s0 }
 0x23c   :  { %477 = vrot.lane.b32.xlu0 %v3382_v62, %s3286_s0 }
 0x240   :  { %481 = vrot.lane.b32.xlu0 %v3386_v63, %s3286_s0 }
 0x297   :  { %v189_v40 = vpop.xlane.xlu0 %188 }
 0x298   :  { %v193_v41 = vmul.f32 0.03125, %v189_v40 }
 0x29a   :  { %v195_v42 = vadd.f32 1e-05, %v193_v41 }
 0x29b   :  { %v192_v43 = vpop.xlane.xlu0 %191 }
 0x29c   :  { %3132 = vrsqrt.f32 %v195_v42  ;;  %v194_v44 = vmul.f32 0.03125, %v192_v43 }
 0x29e   :  { %v196_v46 = vadd.f32 1e-05, %v194_v44 }
 0x29f   :  { %v3449_v22 = vpop.permute.xlu0 %429 }
 0x2a0   :  { %3134 = vrsqrt.f32 %v196_v46 }
 0x2a3   :  { %v3453_v25 = vpop.permute.xlu0 %435 }
 0x2a6   :  { %v3133_v51 = vpop.eup %3132 }
 0x2a7   :  { %v199_v52 = vmul.f32 %v3133_v51, %v183_v28  ;;  %v3462_v37 = vpop.permute.xlu0 %439 }
 0x2a9   :  { %v205_v54 = vmul.f32 %v204_v50, %v199_v52 }
 0x2aa   :  { %v3135_v55 = vpop.eup %3134 }
 0x2ab   :  { %v200_v56 = vmul.f32 %v3135_v55, %v184_v27  ;;  %v211_v57 = vadd.f32 %v210_v53, %v205_v54 }
 0x2ad   :  { %v206_v58 = vmul.f32 %v204_v50, %v200_v56  ;;  %2654 = vmatprep.mubr.msk.f32.mxu1 %vm173_vm3, %v211_v57  ;;  %v3472_v50 = vpop.permute.xlu0 %443 }
 0x2af   :  { %v212_v59 = vadd.f32 %v210_v53, %v206_v58 }
 0x2b1   :  { %2655 = vmatmul.mubr.msk.f32.vlgmr.msra.gmra.mrb[0].mxu1 %vm173_vm3, %v212_v59  ;;  %v3479_v54 = vpop.permute.xlu0 %469 }
 0x2b5   :  { %v3483_v56 = vpop.permute.xlu0 %473 }
 0x384   :  { %v2656_v2 = vpop.f32.mrb[0].mxu1 }
 0x385   :  { %v295_v3 = vadd.f32 %v2656_v2, %v216_v1  ;;  %v289_v4 = vpop.f32.mrb[1].mxu1 }
 0x386   :  { %v290_v5 = vadd.f32 %v289_v4, %v216_v1 }
 0x387   :  { %v299_v6 = vmul.f32 0.35355338, %v295_v3 }
 0x388   :  { %v298_v7 = vmul.f32 0.35355338, %v290_v5  ;;  %v3395_v8 = vpack.i.bf16 %v295_v3, %v290_v5 }
 0x38a   :  { %3053 = vrot.lane.b32.xlu1 %v3395_v8, %s3284_s1  ;;  %v2901_v9 = vpack.c.bf16 %v299_v6, %v298_v7  ;;  %v3491_v6 = vpop.permute.xlu0 %477 }
 0x38c   :  { %2902 = vmatprep.subr.bf16.mxu0 %v2901_v9 }
 0x38d   :  { %2904 = vmatpush3.bf16.msra.mxu0 %v2901_v9 }
 0x38e   :  { %431 = vrot.lane.b32.xlu1 %v3399_v10, %s3284_s1 }
 0x390   :  { %2662 = vmatmul.mubr.msk.f32.vlgmr.msra.gmra.mrb[2].mxu0 %vm55_vm0, %v3399_v10 }
 0x391   :  { %2664 = vmatprep.mubr.msk.f32.mxu0 %vm55_vm0, %v3401_v11 }
 0x392   :  { %433 = vrot.lane.b32.xlu1 %v3401_v11, %s3284_s1 }
 0x394   :  { %2665 = vmatmul.mubr.msk.f32.gmra.mrb[4].mxu0 %vm55_vm0, %v3378_v61 }
 0x395   :  { %2667 = vmatprep.mubr.msk.f32.mxu0 %vm55_vm0, %v3409_v12 }
 0x396   :  { %437 = vrot.lane.b32.xlu1 %v3409_v12, %s3284_s1 }
 0x398   :  { %2668 = vmatmul.mubr.msk.f32.gmra.mrb[6].mxu0 %vm55_vm0, %v3382_v62 }
 0x399   :  { %2670 = vmatprep.mubr.msk.f32.mxu0 %vm55_vm0, %v3417_v13 }
 0x39a   :  { %441 = vrot.lane.b32.xlu1 %v3417_v13, %s3284_s1 }
 0x39c   :  { %2671 = vmatmul.mubr.msk.f32.gmra.mrb[8].mxu0 %vm55_vm0, %v3386_v63 }
 0x39e   :  { %467 = vrot.lane.b32.xlu1 %v3372_v60, %s3286_s0 }
 0x3a2   :  { %471 = vrot.lane.b32.xlu1 %v3401_v11, %s3286_s0 }
 0x3a6   :  { %475 = vrot.lane.b32.xlu1 %v3409_v12, %s3286_s0 }
 0x3aa   :  { %479 = vrot.lane.b32.xlu1 %v3417_v13, %s3286_s0 }
 0x3fc   :  { %v3054_v14 = vpop.permute.xlu1 %3053 }
 0x3fd   :  { %v3056_v15 = vunpack.i.h.bf16 %v3054_v14  ;;  %v3055_v16 = vunpack.i.l.bf16 %v3054_v14 }
 0x3ff   :  { %v2905_v18 = vpack.c.bf16 %v3056_v15, %v3055_v16 }
 0x400   :  { %v3447_v21 = vpop.permute.xlu1 %431 }
 0x401   :  { %2907 = vmatprep.subr.msk.bf16.mxu1 %vm3437_vm4, %v2905_v18 }
 0x402   :  { %2910 = vmatpush3.bf16.xpose.msk.msra.mxu1 %vm3437_vm4, %v2905_v18 }
 0x404   :  { %v3451_v23 = vpop.permute.xlu1 %433 }
 0x408   :  { %v3459_v31 = vpop.permute.xlu1 %437 }
 0x40c   :  { %v3469_v44 = vpop.permute.xlu1 %441 }
 0x410   :  { %v3481_v55 = vpop.permute.xlu1 %467 }
 0x414   :  { %v3485_v57 = vpop.permute.xlu1 %471 }
 0x418   :  { %v3494_v14 = vpop.permute.xlu1 %475 }
 0x463   :  { %v2663_v24 = vpop.f32.mrb[2].mxu0 }
 0x464   :  { %v390_v26 = vpop.f32.mrb[3].mxu0  ;;  %v454_v28 = vmul.f32 %v2663_v24, %v3447_v21 }
 0x465   :  { %v453_v27 = vmul.f32 %v3449_v22, %v390_v26 }
 0x467   :  { %v2666_v29 = vpop.f32.mrb[4].mxu0  ;;  %2677 = vmatprep.mubr.msk.f32.mxu1 %vm173_vm3, %v453_v27 }
 0x468   :  { %v400_v30 = vpop.f32.mrb[5].mxu0  ;;  %2678 = vmatmul.mubr.msk.f32.vlgmr.msra.gmra.mrb[2].mxu1 %vm173_vm3, %v454_v28  ;;  %v456_v39 = vmul.f32 %v2666_v29, %v3453_v25  ;;  %v3501_v29 = vpop.permute.xlu0 %481 }
 0x469   :  { %v455_v32 = vmul.f32 %v3451_v23, %v400_v30  ;;  %v3503_v30 = vpop.permute.xlu1 %479 }
 0x46b   :  { %v2669_v40 = vpop.f32.mrb[6].mxu0  ;;  %2680 = vmatprep.mubr.msk.f32.mxu1 %vm173_vm3, %v455_v32 }
 0x46c   :  { %v410_v41 = vpop.f32.mrb[7].mxu0  ;;  %2681 = vmatmul.mubr.msk.f32.gmra.mrb[4].mxu1 %vm173_vm3, %v456_v39  ;;  %v458_v43 = vmul.f32 %v2669_v40, %v3462_v37 }
 0x46d   :  { %v457_v42 = vmul.f32 %v3459_v31, %v410_v41 }
 0x46f   :  { %v2672_v46 = vpop.f32.mrb[8].mxu0  ;;  %2683 = vmatprep.mubr.msk.f32.mxu1 %vm173_vm3, %v457_v42 }
 0x470   :  { %v420_v51 = vpop.f32.mrb[9].mxu0  ;;  %2684 = vmatmul.mubr.msk.f32.gmra.mrb[6].mxu1 %vm173_vm3, %v458_v43  ;;  %v460_v53 = vmul.f32 %v2672_v46, %v3472_v50 }
 0x471   :  { %v459_v52 = vmul.f32 %v3469_v44, %v420_v51 }
 0x473   :  { %2686 = vmatprep.mubr.msk.f32.mxu1 %vm173_vm3, %v459_v52 }
 0x474   :  { %2687 = vmatmul.mubr.msk.f32.gmra.mrb[8].mxu1 %vm173_vm3, %v460_v53 }
 0x53b   :  { %v2679_v58 = vpop.f32.mrb[2].mxu1 }
 0x53c   :  { %v591_v59 = vadd.f32 %v2679_v58, %v3479_v54  ;;  %v585_v1 = vpop.f32.mrb[3].mxu1 }
 0x53d   :  { %v586_v2 = vadd.f32 %v585_v1, %v3481_v55 }
 0x53e   :  { %v627_v3 = vsel %vm55_vm0, %v591_v59, -inf }
 0x53f   :  { %v2682_v4 = vpop.f32.mrb[4].mxu1  ;;  %628 = vmax.xlane.f32.xlu0 %v627_v3  ;;  %v624_v5 = vsel %vm55_vm0, %v586_v2, -inf }
 0x540   :  { %v601_v7 = vadd.f32 %v2682_v4, %v3483_v56  ;;  %625 = vmax.xlane.f32.xlu1 %v624_v5  ;;  %v595_v9 = vpop.f32.mrb[5].mxu1 }
 0x541   :  { %v596_v15 = vadd.f32 %v595_v9, %v3485_v57 }
 0x542   :  { %v633_v16 = vsel %vm55_vm0, %v601_v7, -inf }
 0x543   :  { %v2685_v18 = vpop.f32.mrb[6].mxu1  ;;  %v630_v24 = vsel %vm55_vm0, %v596_v15, -inf }
 0x544   :  { %v611_v26 = vadd.f32 %v2685_v18, %v3491_v6  ;;  %v605_v27 = vpop.f32.mrb[7].mxu1  ;;  %631 = vmax.xlane.f32.xlu0 %v630_v24  ;;  %634 = vmax.xlane.f32.xlu1 %v633_v16 }
 0x545   :  { %v606_v28 = vadd.f32 %v605_v27, %v3494_v14 }
 0x546   :  { %v639_v32 = vsel %vm55_vm0, %v611_v26, -inf }
 0x547   :  { %v2688_v39 = vpop.f32.mrb[8].mxu1  ;;  %v636_v40 = vsel %vm55_vm0, %v606_v28, -inf }
 0x548   :  { %v621_v41 = vadd.f32 %v2688_v39, %v3501_v29  ;;  %v615_v42 = vpop.f32.mrb[9].mxu1  ;;  %637 = vmax.xlane.f32.xlu0 %v636_v40  ;;  %640 = vmax.xlane.f32.xlu1 %v639_v32 }
 0x549   :  { %v616_v43 = vadd.f32 %v615_v42, %v3503_v30 }
 0x54a   :  { %v645_v46 = vsel %vm55_vm0, %v621_v41, -inf }
 0x54b   :  { %v642_v51 = vsel %vm55_vm0, %v616_v43, -inf }
 0x54c   :  { %643 = vmax.xlane.f32.xlu0 %v642_v51  ;;  %646 = vmax.xlane.f32.xlu1 %v645_v46 }
 0x5cc   :  { %v629_v52 = vpop.xlane.xlu0 %628 }
 0x5cd   :  { %v649_v53 = vsub.f32 %v591_v59, %v629_v52  ;;  %v626_v58 = vpop.xlane.xlu1 %625 }
 0x5ce   :  { %v648_v1 = vsub.f32 %v586_v2, %v626_v58 }
 0x5cf   :  { %v658_v3 = vmul.f32 1.442695, %v649_v53 }
 0x5d0   :  { %v656_v4 = vmul.f32 1.442695, %v648_v1 }
 0x5d1   :  { %3136 = vpow2.f32 %v658_v3  ;;  %v635_v5 = vpop.xlane.xlu1 %634  ;;  %v632_v9 = vpop.xlane.xlu0 %631 }
 0x5d2   :  { %3138 = vpow2.f32 %v656_v4  ;;  %v651_v16 = vsub.f32 %v601_v7, %v635_v5  ;;  %v650_v18 = vsub.f32 %v596_v15, %v632_v9 }
 0x5d4   :  { %v662_v24 = vmul.f32 1.442695, %v651_v16  ;;  %v660_v27 = vmul.f32 1.442695, %v650_v18 }
 0x5d5   :  { %v641_v32 = vpop.xlane.xlu1 %640  ;;  %v638_v39 = vpop.xlane.xlu0 %637 }
 0x5d6   :  { %3140 = vpow2.f32 %v662_v24  ;;  %v653_v40 = vsub.f32 %v611_v26, %v641_v32  ;;  %v652_v42 = vsub.f32 %v606_v28, %v638_v39 }
 0x5d7   :  { %3142 = vpow2.f32 %v660_v27 }
 0x5d8   :  { %v666_v46 = vmul.f32 1.442695, %v653_v40  ;;  %v664_v59 = vmul.f32 1.442695, %v652_v42  ;;  %v3067_v40 = vpack.i.bf16 %v3352_v38, %v3346_v35 }
 0x5d9   :  { %v647_v51 = vpop.xlane.xlu1 %646  ;;  %v644_v2 = vpop.xlane.xlu0 %643 }
 0x5da   :  { %3144 = vpow2.f32 %v666_v46  ;;  %v655_v52 = vsub.f32 %v621_v41, %v647_v51  ;;  %v654_v53 = vsub.f32 %v616_v43, %v644_v2 }
 0x5db   :  { %v3137_v58 = vpop.eup %3136  ;;  %3146 = vpow2.f32 %v664_v59 }
 0x5dc   :  { %v3139_v1 = vpop.eup %3138  ;;  %v670_v7 = vmul.f32 1.442695, %v655_v52  ;;  %v668_v15 = vmul.f32 1.442695, %v654_v53  ;;  %v675_v3 = vsel %vm55_vm0, %v3137_v58, 0.0 }
 0x5dd   :  { %676 = vadd.xlane.f32.xlu1 %v675_v3  ;;  %v672_v4 = vsel %vm55_vm0, %v3139_v1, 0.0 }
 0x5de   :  { %3148 = vpow2.f32 %v670_v7  ;;  %673 = vadd.xlane.f32.xlu0 %v672_v4 }
 0x5df   :  { %3150 = vpow2.f32 %v668_v15 }
 0x5e0   :  { %v3141_v26 = vpop.eup %3140 }
 0x5e1   :  { %v3143_v28 = vpop.eup %3142  ;;  %v681_v5 = vsel %vm55_vm0, %v3141_v26, 0.0 }
 0x5e2   :  { %682 = vadd.xlane.f32.xlu1 %v681_v5  ;;  %v678_v41 = vsel %vm55_vm0, %v3143_v28, 0.0 }
 0x5e3   :  { %679 = vadd.xlane.f32.xlu0 %v678_v41 }
 0x5e4   :  { %v3145_v43 = vpop.eup %3144 }
 0x5e5   :  { %v3147_v9 = vpop.eup %3146  ;;  %v687_v16 = vsel %vm55_vm0, %v3145_v43, 0.0 }
 0x5e6   :  { %688 = vadd.xlane.f32.xlu1 %v687_v16  ;;  %v684_v18 = vsel %vm55_vm0, %v3147_v9, 0.0 }
 0x5e7   :  { %685 = vadd.xlane.f32.xlu0 %v684_v18 }
 0x5e8   :  { %v3149_v24 = vpop.eup %3148 }
 0x5e9   :  { %v3151_v27 = vpop.eup %3150  ;;  %v693_v32 = vsel %vm55_vm0, %v3149_v24, 0.0 }
 0x5ea   :  { %694 = vadd.xlane.f32.xlu1 %v693_v32  ;;  %v690_v39 = vsel %vm55_vm0, %v3151_v27, 0.0 }
 0x5eb   :  { %691 = vadd.xlane.f32.xlu0 %v690_v39 }
 0x5fb   :  { %3063 = vrot.lane.b32.xlu1 %v3062_v36, %s3288_s28 }
 0x5ff   :  { %3068 = vrot.lane.b32.xlu1 %v3067_v40, %s3288_s28 }
 0x601   :  { %3058 = vrot.lane.b32.xlu0 %v3395_v8, %s3287_s27 }
 0x66a   :  { %v677_v46 = vpop.xlane.xlu1 %676 }
 0x66b   :  { %v674_v42 = vpop.xlane.xlu0 %673 }
 0x66c   :  { %3152 = vrcp.f32 %v674_v42 }
 0x66d   :  { %3154 = vrcp.f32 %v677_v46 }
 0x66f   :  { %v683_v51 = vpop.xlane.xlu1 %682 }
 0x670   :  { %v680_v59 = vpop.xlane.xlu0 %679 }
 0x671   :  { %3156 = vrcp.f32 %v680_v59 }
 0x672   :  { %3158 = vrcp.f32 %v683_v51 }
 0x673   :  { %v689_v7 = vpop.xlane.xlu1 %688 }
 0x674   :  { %v686_v2 = vpop.xlane.xlu0 %685 }
 0x675   :  { %3160 = vrcp.f32 %v686_v2 }
 0x676   :  { %v3153_v52 = vpop.eup %3152  ;;  %3162 = vrcp.f32 %v689_v7 }
 0x677   :  { %v704_v8 = vmul.f32 %v3153_v52, %v3139_v1  ;;  %v695_v36 = vpop.xlane.xlu1 %694  ;;  %v3155_v15 = vpop.eup %3154 }
 0x678   :  { %v692_v53 = vpop.xlane.xlu0 %691  ;;  %v705_v4 = vmul.f32 %v3155_v15, %v3137_v58 }
 0x679   :  { %2693 = vmatprep.mubr.msk.f32.mxu0 %vm55_vm0, %v704_v8  ;;  %3164 = vrcp.f32 %v692_v53 }
 0x67a   :  { %3166 = vrcp.f32 %v695_v36 }
 0x67b   :  { %v3157_v3 = vpop.eup %3156 }
 0x67c   :  { %v3059_v33 = vpop.permute.xlu0 %3058  ;;  %v3159_v1 = vpop.eup %3158  ;;  %v706_v5 = vmul.f32 %v3157_v3, %v3143_v28 }
 0x67d   :  { %v3061_v34 = vunpack.i.h.bf16 %v3059_v33  ;;  %v3060_v35 = vunpack.i.l.bf16 %v3059_v33  ;;  %v707_v16 = vmul.f32 %v3159_v1, %v3141_v26  ;;  %v3064_v28 = vpop.permute.xlu1 %3063 }
 0x67e   :  { %v3066_v59 = vunpack.i.h.bf16 %v3064_v28  ;;  %v3065_v26 = vunpack.i.l.bf16 %v3064_v28 }
 0x67f   :  { %v2911_v38 = vpack.c.bf16 %v3061_v34, %v3060_v35  ;;  %v3161_v41 = vpop.eup %3160 }
 0x680   :  { %v3163_v18 = vpop.eup %3162  ;;  %v708_v32 = vmul.f32 %v3161_v41, %v3147_v9  ;;  %v2915_v51 = vpack.c.bf16 %v3066_v59, %v3065_v26 }
 0x681   :  { %2912 = vmatprep.subr.bf16.mxu0 %v2911_v38  ;;  %v709_v40 = vmul.f32 %v3163_v18, %v3145_v43  ;;  %v3069_v9 = vpop.permute.xlu1 %3068 }
 0x682   :  { %2914 = vmatpush3.bf16.msra.mxu0 %v2911_v38  ;;  %v3071_v2 = vunpack.i.h.bf16 %v3069_v9  ;;  %v3070_v52 = vunpack.i.l.bf16 %v3069_v9  ;;  %2916 = vmatprep.subr.bf16.mxu1 %v2915_v51 }
 0x683   :  { %v3165_v39 = vpop.eup %3164  ;;  %2918 = vmatpush3.bf16.msra.mxu1 %v2915_v51 }
 0x684   :  { %v3167_v42 = vpop.eup %3166  ;;  %v710_v46 = vmul.f32 %v3165_v39, %v3151_v27  ;;  %v2919_v8 = vpack.c.bf16 %v3071_v2, %v3070_v52 }
 0x685   :  { %2694 = vmatmul.mubr.msk.f32.vlgmr.msra.gmra.mrb[10].mxu0 %vm55_vm0, %v705_v4  ;;  %v711_v58 = vmul.f32 %v3167_v42, %v3149_v24 }
 0x686   :  { %2696 = vmatprep.mubr.msk.f32.mxu0 %vm55_vm0, %v706_v5  ;;  %2920 = vmatprep.subr.bf16.mxu1 %v2919_v8 }
 0x687   :  { %2922 = vmatpush3.bf16.msra.mxu1 %v2919_v8 }
 0x689   :  { %2697 = vmatmul.mubr.msk.f32.gmra.mrb[12].mxu0 %vm55_vm0, %v707_v16 }
 0x68a   :  { %2699 = vmatprep.mubr.msk.f32.mxu0 %vm55_vm0, %v708_v32 }
 0x68d   :  { %2700 = vmatmul.mubr.msk.f32.gmra.mrb[14].mxu0 %vm55_vm0, %v709_v40 }
 0x68e   :  { %2702 = vmatprep.mubr.msk.f32.mxu0 %vm55_vm0, %v710_v46  ;;  %v3850_v46 = vsub.s32 3, %v3356_v45 }
 0x691   :  { %2703 = vmatmul.mubr.msk.f32.gmra.mrb[16].mxu0 %vm55_vm0, %v711_v58  ;;  %v963_v58 = vrot.slane %v3361_v48, %v3850_v46 }
 0x758   :  { %v2695_v43 = vpop.f32.mrb[10].mxu0 }
 0x759   :  { %v808_v27 = vpop.f32.mrb[11].mxu0  ;;  %v848_v7 = vmul.f32 %v2695_v43, %v3447_v21 }
 0x75a   :  { %v847_v34 = vmul.f32 %v808_v27, %v3449_v22 }
 0x75c   :  { %v2698_v53 = vpop.f32.mrb[12].mxu0 }
 0x75d   :  { %v850_v24 = vmul.f32 %v2698_v53, %v3453_v25  ;;  %v818_v33 = vpop.f32.mrb[13].mxu0 }
 0x75e   :  { %v849_v35 = vmul.f32 %v818_v33, %v3451_v23 }
 0x75f   :  { %v856_v36 = vadd.f32 %v850_v24, %v848_v7 }
 0x760   :  { %v855_v38 = vadd.f32 %v849_v35, %v847_v34  ;;  %v2701_v15 = vpop.f32.mrb[14].mxu0 }
 0x761   :  { %v852_v3 = vmul.f32 %v2701_v15, %v3462_v37  ;;  %v828_v4 = vpop.f32.mrb[15].mxu0 }
 0x762   :  { %v851_v1 = vmul.f32 %v828_v4, %v3459_v31  ;;  %v156_v4 = vld [vmem:[#allocation2 + $0x48] sm:$0xff] }
 0x763   :  { %v858_v5 = vadd.f32 %v856_v36, %v852_v3  ;;  %v153_v36 = vld [vmem:[#allocation2 + $0x30] sm:$0xff]  ;;  %v155_v3 = vld [vmem:[#allocation2 + $0x40] sm:$0xff] }
 0x764   :  { %v857_v41 = vadd.f32 %v855_v38, %v851_v1  ;;  %v2704_v16 = vpop.f32.mrb[16].mxu0  ;;  %v154_v38 = vld [vmem:[#allocation2 + $0x38] sm:$0xff]  ;;  %v2927_v1 = vpack.c.bf16 %v156_v4, %v155_v3  ;;  %v3594_v3 = vld [vmem:[#allocation2 + $0xc8] sm:$0xff] }
 0x765   :  { %v854_v18 = vmul.f32 %v2704_v16, %v3472_v50  ;;  %v838_v32 = vpop.f32.mrb[17].mxu0  ;;  %v2923_v15 = vpack.c.bf16 %v154_v38, %v153_v36  ;;  %v3588_v36 = vld [vmem:[#allocation2 + $0xb8] sm:$0xff]  ;;  %3869 = vst [vmem:[#allocation11_spill] sm:$0xff] %v3594_v3 }
 0x766   :  { %v853_v39 = vmul.f32 %v838_v32, %v3469_v44  ;;  %3867 = vst [vmem:[#allocation9_spill] sm:$0xff] %v3588_v36 }
 0x767   :  { %v860_v40 = vadd.f32 %v858_v5, %v854_v18  ;;  %2924 = vmatprep.subr.bf16.mxu0 %v2923_v15 }
 0x768   :  { %v859_v42 = vadd.f32 %v857_v41, %v853_v39  ;;  %2926 = vmatpush3.bf16.msra.mxu0 %v2923_v15  ;;  %v3592_v15 = vld [vmem:[#allocation2 + $0xc0] sm:$0xff] }
 0x769   :  { %2928 = vmatprep.subr.bf16.mxu0 %v2927_v1  ;;  %3868 = vst [vmem:[#allocation10_spill] sm:$0xff] %v3592_v15  ;;  %v2943_v4 = vpack.c.bf16 %v3594_v3, %v3592_v15 }
 0x76a   :  { %2713 = vmatprep.mubr.msk.f32.mxu1 %vm173_vm3, %v859_v42  ;;  %v3848_v42 = vsub.s32 5, %v3356_v45 }
 0x76b   :  { %2714 = vmatmul.mubr.msk.f32.vlgmr.msra.gmra.mrb[10].mxu1 %vm173_vm3, %v860_v40  ;;  %v3849_v40 = vsub.s32 4, %v3356_v45 }
 0x76c   :  { %2930 = vmatpush3.bf16.msra.mxu0 %v2927_v1  ;;  %v3598_v1 = vld [vmem:[#allocation2 + $0xd0] sm:$0xff] }
 0x76d   :  { %3870 = vst [vmem:[#allocation12_spill] sm:$0xff] %v3598_v1 }
 0x83e   :  { %v2715_v28 = vpop.f32.mrb[10].mxu1 }
 0x83f   :  { %v959_v59 = vadd.f32 %v2715_v28, %v3330_v19  ;;  %v949_v26 = vpop.f32.mrb[11].mxu1 }
 0x840   :  { %v958_v51 = vadd.f32 %v949_v26, %v3332_v20  ;;  %v1001_v26 = vrot.slane %v3361_v48, %v3848_v42 }
 0x841   :  { %v3552_v9 = vadd.f32 %v963_v58, %v959_v59 }
 0x842   :  { %v3554_v2 = vadd.f32 %v963_v58, %v958_v51  ;;  %v995_v58 = vrot.slane %v3361_v48, %v3849_v40 }
 0x843   :  { %v969_v52 = vsel %vm173_vm3, %v3552_v9, 0.0 }
 0x844   :  { %970 = vadd.xlane.f32.xlu1 %v969_v52  ;;  %v966_v8 = vsel %vm173_vm3, %v3554_v2, 0.0 }
 0x845   :  { %967 = vadd.xlane.f32.xlu0 %v966_v8 }
 0x8d1   :  { %v971_v43 = vpop.xlane.xlu1 %970 }
 0x8d2   :  { %v973_v27 = vmul.f32 0.03125, %v971_v43  ;;  %v968_v53 = vpop.xlane.xlu0 %967 }
 0x8d3   :  { %v972_v7 = vmul.f32 0.03125, %v968_v53 }
 0x8d4   :  { %v975_v19 = vsub.f32 %v3552_v9, %v973_v27 }
 0x8d5   :  { %v974_v20 = vsub.f32 %v3554_v2, %v972_v7  ;;  %v3574_v7 = vld [vmem:[#allocation2 + $0x90] sm:$0xff] }
 0x8d6   :  { %v977_v34 = vmul.f32 %v975_v19, %v975_v19 }
 0x8d7   :  { %v976_v24 = vmul.f32 %v974_v20, %v974_v20 }
 0x8d8   :  { %v981_v35 = vsel %vm173_vm3, %v977_v34, 0.0  ;;  %v3582_v34 = vld [vmem:[#allocation2 + $0xa8] sm:$0xff] }
 0x8d9   :  { %v978_v33 = vsel %vm173_vm3, %v976_v24, 0.0  ;;  %v3576_v24 = vld [vmem:[#allocation2 + $0x98] sm:$0xff] }
 0x8da   :  { %979 = vadd.xlane.f32.xlu0 %v978_v33  ;;  %v3580_v33 = vld [vmem:[#allocation2 + $0xa0] sm:$0xff] }
 0x8de   :  { %982 = vadd.xlane.f32.xlu0 %v981_v35  ;;  %v3586_v35 = vld [vmem:[#allocation2 + $0xb0] sm:$0xff] }
 0x8df   :  { %3866 = vst [vmem:[#allocation8_spill] sm:$0xff] %v3586_v35  ;;  %v2939_v38 = vpack.c.bf16 %v3588_v36, %v3586_v35 }
 0x967   :  { %v980_v5 = vpop.xlane.xlu0 %979 }
 0x968   :  { %v984_v41 = vmul.f32 0.03125, %v980_v5  ;;  %v3600_v5 = vld [vmem:[#allocation2 + $0xd8] sm:$0xff] }
 0x969   :  { %3871 = vst [vmem:[#allocation13_spill] sm:$0xff] %v3600_v5 }
 0x96a   :  { %v986_v16 = vadd.f32 1e-05, %v984_v41  ;;  %v2947_v41 = vpack.c.bf16 %v3600_v5, %v3598_v1 }
 0x96b   :  { %v983_v18 = vpop.xlane.xlu0 %982 }
 0x96c   :  { %3168 = vrsqrt.f32 %v986_v16  ;;  %v985_v32 = vmul.f32 0.03125, %v983_v18  ;;  %v3604_v16 = vld [vmem:[#allocation2 + $0xe0] sm:$0xff]  ;;  %v3606_v18 = vld [vmem:[#allocation2 + $0xe8] sm:$0xff] }
 0x96d   :  { %3872 = vst [vmem:[#allocation14_spill] sm:$0xff] %v3604_v16  ;;  %3873 = vst [vmem:[#allocation15_spill] sm:$0xff] %v3606_v18 }
 0x96e   :  { %v987_v39 = vadd.f32 1e-05, %v985_v32  ;;  %v2951_v32 = vpack.c.bf16 %v3606_v18, %v3604_v16 }
 0x970   :  { %3170 = vrsqrt.f32 %v987_v39  ;;  %v3610_v39 = vld [vmem:[#allocation2 + $0xf0] sm:$0xff] }
 0x971   :  { %3874 = vst [vmem:[#allocation16_spill] sm:$0xff] %v3610_v39 }
 0x976   :  { %v3169_v28 = vpop.eup %3168 }
 0x977   :  { %v990_v59 = vmul.f32 %v3169_v28, %v974_v20  ;;  %v2931_v20 = vpack.c.bf16 %v3576_v24, %v3574_v7 }
 0x979   :  { %v996_v51 = vmul.f32 %v995_v58, %v990_v59  ;;  %2932 = vmatprep.subr.bf16.mxu1 %v2931_v20  ;;  %v3616_v59 = vld [vmem:[#allocation2 + $0x100] sm:$0xff] }
 0x97a   :  { %v3171_v52 = vpop.eup %3170  ;;  %2934 = vmatpush3.bf16.msra.mxu1 %v2931_v20  ;;  %3876 = vst [vmem:[#allocation18_spill] sm:$0xff] %v3616_v59 }
 0x97b   :  { %v991_v8 = vmul.f32 %v3171_v52, %v975_v19  ;;  %v1002_v43 = vadd.f32 %v1001_v26, %v996_v51  ;;  %v2935_v19 = vpack.c.bf16 %v3582_v34, %v3580_v33  ;;  %v3854_v52 = vsub.s32 6, %v3356_v45 }
 0x97d   :  { %v997_v27 = vmul.f32 %v995_v58, %v991_v8  ;;  %2724 = vmatprep.mubr.msk.f32.mxu0 %vm173_vm3, %v1002_v43  ;;  %2936 = vmatprep.subr.bf16.mxu1 %v2935_v19  ;;  %v3612_v58 = vld [vmem:[#allocation2 + $0xf8] sm:$0xff]  ;;  %v1007_v8 = vrot.slane %v3361_v48, %v3854_v52 }
 0x97e   :  { %2938 = vmatpush3.bf16.msra.mxu1 %v2935_v19  ;;  %3875 = vst [vmem:[#allocation17_spill] sm:$0xff] %v3612_v58  ;;  %v2955_v28 = vpack.c.bf16 %v3612_v58, %v3610_v39 }
 0x97f   :  { %v1003_v53 = vadd.f32 %v1001_v26, %v997_v27  ;;  %2940 = vmatprep.subr.bf16.mxu1 %v2939_v38  ;;  %v3618_v26 = vld [vmem:[#allocation2 + $0x108] sm:$0xff] }
 0x980   :  { %3877 = vst [vmem:[#allocation19_spill] sm:$0xff] %v3618_v26  ;;  %v2959_v51 = vpack.c.bf16 %v3618_v26, %v3616_v59 }
 0x981   :  { %2725 = vmatmul.mubr.msk.f32.vlgmr.msra.gmra.mrb[18].mxu0 %vm173_vm3, %v1003_v53 }
 0x982   :  { %2942 = vmatpush3.bf16.msra.mxu1 %v2939_v38 }
 0x983   :  { %2944 = vmatprep.subr.bf16.mxu1 %v2943_v4 }
 0x986   :  { %2946 = vmatpush3.bf16.msra.mxu1 %v2943_v4 }
 0x987   :  { %2948 = vmatprep.subr.bf16.mxu1 %v2947_v41 }
 0x98a   :  { %2950 = vmatpush3.bf16.msra.mxu1 %v2947_v41 }
 0x98b   :  { %2952 = vmatprep.subr.bf16.mxu1 %v2951_v32 }
 0x98e   :  { %2954 = vmatpush3.bf16.msra.mxu1 %v2951_v32 }
 0x98f   :  { %2956 = vmatprep.subr.bf16.mxu1 %v2955_v28 }
 0x992   :  { %2958 = vmatpush3.bf16.msra.mxu1 %v2955_v28 }
 0x993   :  { %2960 = vmatprep.subr.bf16.mxu1 %v2959_v51 }
 0x996   :  { %2962 = vmatpush3.bf16.msra.mxu1 %v2959_v51 }
 0xa54   :  { %v2726_v43 = vpop.f32.mrb[18].mxu0 }
 0xa55   :  { %v1086_v27 = vadd.f32 %v2726_v43, %v1007_v8  ;;  %v1080_v53 = vpop.f32.mrb[19].mxu0 }
 0xa56   :  { %v1081_v20 = vadd.f32 %v1080_v53, %v1007_v8 }
 0xa57   :  { %v1092_v19 = vmul.f32 0.70710677, %v1086_v27 }
 0xa58   :  { %v1091_v38 = vmul.f32 0.70710677, %v1081_v20 }
 0xa59   :  { %v1094_v4 = vsub.f32 0.0, %v1092_v19  ;;  %vm1136_vm5 = vcmp.lt.f32.partialorder %v1092_v19, 0.0 }
 0xa5a   :  { %v1093_v41 = vsub.f32 0.0, %v1091_v38  ;;  %vm1135_vm6 = vcmp.lt.f32.partialorder %v1091_v38, 0.0 }
 0xa5b   :  { %v1096_v32 = vmax.f32 %v1092_v19, %v1094_v4 }
 0xa5c   :  { %v1095_v28 = vmax.f32 %v1091_v38, %v1093_v41 }
 0xa5d   :  { %v1098_v42 = vmul.f32 0.3275911, %v1096_v32  ;;  %v1124_v26 = vsub.f32 0.0, %v1096_v32 }
 0xa5e   :  { %v1097_v40 = vmul.f32 0.3275911, %v1095_v28  ;;  %v1123_v59 = vsub.f32 0.0, %v1095_v28 }
 0xa5f   :  { %v1100_v46 = vadd.f32 1.0, %v1098_v42  ;;  %v1126_v52 = vmul.f32 %v1124_v26, %v1096_v32 }
 0xa60   :  { %v1099_v51 = vadd.f32 1.0, %v1097_v40  ;;  %v1125_v18 = vmul.f32 %v1123_v59, %v1095_v28 }
 0xa61   :  { %3172 = vrcp.f32 %v1100_v46  ;;  %v1129_v16 = vmul.f32 1.442695, %v1126_v52 }
 0xa62   :  { %3174 = vrcp.f32 %v1099_v51  ;;  %v1127_v4 = vmul.f32 1.442695, %v1125_v18 }
 0xa63   :  { %3176 = vpow2.f32 %v1129_v16 }
 0xa64   :  { %3178 = vpow2.f32 %v1127_v4 }
 0xa6b   :  { %v3173_v58 = vpop.eup %3172 }
 0xa6c   :  { %v3175_v39 = vpop.eup %3174  ;;  %v1106_v43 = vmul.f32 1.0614054, %v3173_v58 }
 0xa6d   :  { %v1105_v8 = vmul.f32 1.0614054, %v3175_v39  ;;  %v3177_v28 = vpop.eup %3176 }
 0xa6e   :  { %v1108_v53 = vadd.f32 -1.4531521, %v1106_v43  ;;  %v3179_v52 = vpop.eup %3178 }
 0xa6f   :  { %v1107_v5 = vadd.f32 -1.4531521, %v1105_v8 }
 0xa70   :  { %v1110_v1 = vmul.f32 %v3173_v58, %v1108_v53 }
 0xa71   :  { %v1109_v41 = vmul.f32 %v3175_v39, %v1107_v5 }
 0xa72   :  { %v1112_v3 = vadd.f32 1.4214138, %v1110_v1 }
 0xa73   :  { %v1111_v42 = vadd.f32 1.4214138, %v1109_v41 }
 0xa74   :  { %v1114_v40 = vmul.f32 %v3173_v58, %v1112_v3 }
 0xa75   :  { %v1113_v46 = vmul.f32 %v3175_v39, %v1111_v42  ;;  %v1089_v42 = vmul.f32 0.5, %v1081_v20 }
 0xa76   :  { %v1116_v51 = vadd.f32 -0.28449672, %v1114_v40 }
 0xa77   :  { %v1115_v15 = vadd.f32 -0.28449672, %v1113_v46 }
 0xa78   :  { %v1118_v36 = vmul.f32 %v3173_v58, %v1116_v51 }
 0xa79   :  { %v1117_v26 = vmul.f32 %v3175_v39, %v1115_v15  ;;  %v1090_v15 = vmul.f32 0.5, %v1086_v27 }
 0xa7a   :  { %v1120_v32 = vadd.f32 0.2548296, %v1118_v36 }
 0xa7b   :  { %v1119_v35 = vadd.f32 0.2548296, %v1117_v26 }
 0xa7c   :  { %v1122_v59 = vmul.f32 %v3173_v58, %v1120_v32 }
 0xa7d   :  { %v1121_v43 = vmul.f32 %v3175_v39, %v1119_v35  ;;  %v1224_v35 = vsub.s32 7, %v3356_v45 }
 0xa7e   :  { %v1132_v8 = vmul.f32 %v3177_v28, %v1122_v59 }
 0xa7f   :  { %v1131_v53 = vmul.f32 %v3179_v52, %v1121_v43  ;;  %v1225_v39 = vrot.slane %v3361_v48, %v1224_v35 }
 0xa80   :  { %v1134_v18 = vsub.f32 1.0, %v1132_v8 }
 0xa81   :  { %v1133_v5 = vsub.f32 1.0, %v1131_v53 }
 0xa82   :  { %v1138_v1 = vsub.f32 0.0, %v1134_v18 }
 0xa83   :  { %v1137_v16 = vsub.f32 0.0, %v1133_v5 }
 0xa84   :  { %v1140_v3 = vsel %vm1136_vm5, %v1138_v1, %v1134_v18  ;;  %v3646_v1 = vld [vmem:[#allocation2 + $0x58] sm:$0xff] }
 0xa85   :  { %v1142_v4 = vadd.f32 1.0, %v1140_v3  ;;  %v1139_v41 = vsel %vm1135_vm6, %v1137_v16, %v1133_v5  ;;  %v3644_v5 = vld [vmem:[#allocation2 + $0x50] sm:$0xff]  ;;  %v3650_v3 = vld [vmem:[#allocation2 + $0x60] sm:$0xff] }
 0xa86   :  { %v1141_v40 = vadd.f32 1.0, %v1139_v41  ;;  %v2963_v16 = vpack.c.bf16 %v3646_v1, %v3644_v5 }
 0xa87   :  { %v1144_v46 = vmul.f32 %v1142_v4, %v1090_v15  ;;  %v3652_v4 = vld [vmem:[#allocation2 + $0x68] sm:$0xff] }
 0xa88   :  { %v1143_v36 = vmul.f32 %v1141_v40, %v1089_v42  ;;  %2964 = vmatprep.subr.bf16.mxu0 %v2963_v16  ;;  %v2967_v41 = vpack.c.bf16 %v3652_v4, %v3650_v3 }
 0xa89   :  { %2966 = vmatpush3.bf16.msra.mxu0 %v2963_v16 }
 0xa8a   :  { %2759 = vmatprep.mubr.f32.mxu1 %v1143_v36  ;;  %2968 = vmatprep.subr.bf16.mxu0 %v2967_v41 }
 0xa8b   :  { %2760 = vmatmul.mubr.f32.vlgmr.msra.gmra.mrb[12].mxu1 %v1144_v46 }
 0xa8d   :  { %2970 = vmatpush3.bf16.msra.mxu0 %v2967_v41 }
 0xb5e   :  { %v2761_v58 = vpop.f32.mrb[12].mxu1 }
 0xb5f   :  { %v1221_v19 = vadd.f32 %v2761_v58, %v3552_v9  ;;  %v1211_v51 = vpop.f32.mrb[13].mxu1  ;;  %v3656_v58 = vld [vmem:[#allocation2 + $0x178] sm:$0xff] }
 0xb60   :  { %v1220_v38 = vadd.f32 %v1211_v51, %v3554_v2 }
 0xb61   :  { %v3632_v26 = vadd.f32 %v1225_v39, %v1221_v19  ;;  %v1265_v19 = vrot.slane %v3656_v58, %v3359_v47 }
 0xb62   :  { %v3634_v20 = vadd.f32 %v1225_v39, %v1220_v38 }
 0xb63   :  { %v1239_v27 = vsel %vm173_vm3, %v3632_v26, 0.0 }
 0xb64   :  { %1240 = vadd.xlane.f32.xlu0 %v1239_v27  ;;  %v1236_v32 = vsel %vm173_vm3, %v3634_v20, 0.0 }
 0xb65   :  { %1237 = vadd.xlane.f32.xlu1 %v1236_v32 }
 0xbf1   :  { %v1241_v59 = vpop.xlane.xlu0 %1240 }
 0xbf2   :  { %v1243_v48 = vmul.f32 0.03125, %v1241_v59  ;;  %v1238_v28 = vpop.xlane.xlu1 %1237  ;;  %v1271_v59 = vrot.slane %v3656_v58, %v3364_v49 }
 0xbf3   :  { %v1242_v43 = vmul.f32 0.03125, %v1238_v28 }
 0xbf4   :  { %v1245_v9 = vsub.f32 %v3632_v26, %v1243_v48 }
 0xbf5   :  { %v1244_v2 = vsub.f32 %v3634_v20, %v1242_v43 }
 0xbf6   :  { %v1247_v52 = vmul.f32 %v1245_v9, %v1245_v9 }
 0xbf7   :  { %v1246_v8 = vmul.f32 %v1244_v2, %v1244_v2 }
 0xbf8   :  { %v1251_v53 = vsel %vm173_vm3, %v1247_v52, 0.0 }
 0xbf9   :  { %1252 = vadd.xlane.f32.xlu0 %v1251_v53  ;;  %v1248_v18 = vsel %vm173_vm3, %v1246_v8, 0.0  ;;  %v1277_v8 = vrot.slane %v3656_v58, %v3391_v0 }
 0xbfa   :  { %1249 = vadd.xlane.f32.xlu1 %v1248_v18 }
 0xc86   :  { %v1253_v42 = vpop.xlane.xlu0 %1252 }
 0xc87   :  { %v1255_v40 = vmul.f32 0.03125, %v1253_v42  ;;  %v1250_v15 = vpop.xlane.xlu1 %1249 }
 0xc88   :  { %v1254_v36 = vmul.f32 0.03125, %v1250_v15 }
 0xc89   :  { %v1257_v46 = vadd.f32 1e-05, %v1255_v40 }
 0xc8a   :  { %v1256_v39 = vadd.f32 1e-05, %v1254_v36 }
 0xc8b   :  { %3180 = vrsqrt.f32 %v1257_v46 }
 0xc8c   :  { %3182 = vrsqrt.f32 %v1256_v39 }
 0xc95   :  { %v3181_v51 = vpop.eup %3180 }
 0xc96   :  { %v3183_v38 = vpop.eup %3182  ;;  %v1261_v27 = vmul.f32 %v3181_v51, %v1245_v9 }
 0xc97   :  { %v1260_v32 = vmul.f32 %v3183_v38, %v1244_v2 }
 0xc98   :  { %v1267_v48 = vmul.f32 %v1265_v19, %v1261_v27 }
 0xc99   :  { %v1266_v28 = vmul.f32 %v1265_v19, %v1260_v32 }
 0xc9a   :  { %v1273_v52 = vadd.f32 %v1271_v59, %v1267_v48 }
 0xc9b   :  { %v1272_v43 = vadd.f32 %v1271_v59, %v1266_v28 }
 0xc9d   :  { %2770 = vmatprep.mubr.msk.f32.mxu0 %vm173_vm3, %v1272_v43 }
 0xc9e   :  { %2771 = vmatmul.mubr.msk.f32.vlgmr.msra.gmra.mrb[20].mxu0 %vm173_vm3, %v1273_v52 }
 0xc9f   :  { %2777 = vmatprep.mubr.msk.f32.mxu0 %vm55_vm0, %v3372_v60 }
 0xd71   :  { %v2772_v53 = vpop.f32.mrb[20].mxu0 }
 0xd72   :  { %v1356_v9 = vadd.f32 %v2772_v53, %v1277_v8  ;;  %v1350_v2 = vpop.f32.mrb[21].mxu0 }
 0xd73   :  { %v1351_v18 = vadd.f32 %v1350_v2, %v1277_v8 }
 0xd74   :  { %v1360_v16 = vmul.f32 0.35355338, %v1356_v9 }
 0xd75   :  { %v1359_v41 = vmul.f32 0.35355338, %v1351_v18  ;;  %v3668_v42 = vpack.i.bf16 %v1356_v9, %v1351_v18 }
 0xd77   :  { %3073 = vrot.lane.b32.xlu1 %v3668_v42, %s3284_s1  ;;  %v2971_v40 = vpack.c.bf16 %v1360_v16, %v1359_v41 }
 0xd79   :  { %2972 = vmatprep.subr.bf16.mxu0 %v2971_v40 }
 0xd7a   :  { %2974 = vmatpush3.bf16.msra.mxu0 %v2971_v40 }
 0xd7d   :  { %2778 = vmatmul.mubr.msk.f32.vlgmr.msra.gmra.mrb[22].mxu0 %vm55_vm0, %v3399_v10 }
 0xd7e   :  { %2780 = vmatprep.mubr.msk.f32.mxu0 %vm55_vm0, %v3401_v11 }
 0xd81   :  { %2781 = vmatmul.mubr.msk.f32.gmra.mrb[24].mxu0 %vm55_vm0, %v3378_v61 }
 0xd82   :  { %2783 = vmatprep.mubr.msk.f32.mxu0 %vm55_vm0, %v3409_v12 }
 0xd85   :  { %2784 = vmatmul.mubr.msk.f32.gmra.mrb[26].mxu0 %vm55_vm0, %v3382_v62 }
 0xd86   :  { %2786 = vmatprep.mubr.msk.f32.mxu0 %vm55_vm0, %v3417_v13 }
 0xd89   :  { %2787 = vmatmul.mubr.msk.f32.gmra.mrb[28].mxu0 %vm55_vm0, %v3386_v63 }
 0xde9   :  { %v3074_v60 = vpop.permute.xlu1 %3073 }
 0xdea   :  { %v3076_v10 = vunpack.i.h.bf16 %v3074_v60  ;;  %v3075_v15 = vunpack.i.l.bf16 %v3074_v60 }
 0xdec   :  { %v2975_v36 = vpack.c.bf16 %v3076_v10, %v3075_v15 }
 0xdee   :  { %2977 = vmatprep.subr.msk.bf16.mxu0 %vm3437_vm4, %v2975_v36 }
 0xdef   :  { %2980 = vmatpush3.bf16.xpose.msk.msra.mxu0 %vm3437_vm4, %v2975_v36 }
 0xe50   :  { %v2779_v61 = vpop.f32.mrb[22].mxu0 }
 0xe51   :  { %v1427_v11 = vpop.f32.mrb[23].mxu0  ;;  %v1467_v12 = vmul.f32 %v2779_v61, %v3447_v21 }
 0xe52   :  { %v1466_v62 = vmul.f32 %v1427_v11, %v3449_v22 }
 0xe54   :  { %v2782_v13 = vpop.f32.mrb[24].mxu0  ;;  %2793 = vmatprep.mubr.msk.f32.mxu0 %vm173_vm3, %v1466_v62 }
 0xe55   :  { %v1437_v63 = vpop.f32.mrb[25].mxu0  ;;  %2794 = vmatmul.mubr.msk.f32.vlgmr.msra.gmra.mrb[30].mxu0 %vm173_vm3, %v1467_v12  ;;  %v1469_v39 = vmul.f32 %v2782_v13, %v3453_v25 }
 0xe56   :  { %v1468_v46 = vmul.f32 %v1437_v63, %v3451_v23 }
 0xe58   :  { %v2785_v19 = vpop.f32.mrb[26].mxu0  ;;  %2796 = vmatprep.mubr.msk.f32.mxu0 %vm173_vm3, %v1468_v46 }
 0xe59   :  { %v1447_v17 = vpop.f32.mrb[27].mxu0  ;;  %2797 = vmatmul.mubr.msk.f32.gmra.mrb[32].mxu0 %vm173_vm3, %v1469_v39  ;;  %v1471_v38 = vmul.f32 %v2785_v19, %v3462_v37 }
 0xe5a   :  { %v1470_v51 = vmul.f32 %v1447_v17, %v3459_v31 }
 0xe5c   :  { %v2788_v27 = vpop.f32.mrb[28].mxu0  ;;  %2799 = vmatprep.mubr.msk.f32.mxu0 %vm173_vm3, %v1470_v51 }
 0xe5d   :  { %v1457_v32 = vpop.f32.mrb[29].mxu0  ;;  %2800 = vmatmul.mubr.msk.f32.gmra.mrb[34].mxu0 %vm173_vm3, %v1471_v38  ;;  %v1473_v48 = vmul.f32 %v2788_v27, %v3472_v50 }
 0xe5e   :  { %v1472_v59 = vmul.f32 %v1457_v32, %v3469_v44 }
 0xe60   :  { %2802 = vmatprep.mubr.msk.f32.mxu0 %vm173_vm3, %v1472_v59 }
 0xe61   :  { %2803 = vmatmul.mubr.msk.f32.gmra.mrb[36].mxu0 %vm173_vm3, %v1473_v48 }
 0xf28   :  { %v2795_v28 = vpop.f32.mrb[30].mxu0 }
 0xf29   :  { %v1580_v43 = vadd.f32 %v2795_v28, %v3479_v54  ;;  %v1574_v52 = vpop.f32.mrb[31].mxu0 }
 0xf2a   :  { %v1575_v8 = vadd.f32 %v1574_v52, %v3481_v55 }
 0xf2b   :  { %v1616_v53 = vsel %vm55_vm0, %v1580_v43, -inf }
 0xf2c   :  { %1617 = vmax.xlane.f32.xlu0 %v1616_v53  ;;  %v2798_v9 = vpop.f32.mrb[32].mxu0  ;;  %v1613_v16 = vsel %vm55_vm0, %v1575_v8, -inf }
 0xf2d   :  { %v1584_v2 = vpop.f32.mrb[33].mxu0  ;;  %v1590_v18 = vadd.f32 %v2798_v9, %v3483_v56 }
 0xf2e   :  { %v1585_v10 = vadd.f32 %v1584_v2, %v3485_v57 }
 0xf2f   :  { %v1622_v54 = vsel %vm55_vm0, %v1590_v18, -inf }
 0xf30   :  { %v2801_v41 = vpop.f32.mrb[34].mxu0  ;;  %1614 = vmax.xlane.f32.xlu0 %v1613_v16  ;;  %v1619_v56 = vsel %vm55_vm0, %v1585_v10, -inf }
 0xf31   :  { %v1594_v40 = vpop.f32.mrb[35].mxu0  ;;  %v1600_v61 = vadd.f32 %v2801_v41, %v3491_v6 }
 0xf32   :  { %v1595_v60 = vadd.f32 %v1594_v40, %v3494_v14 }
 0xf33   :  { %v1628_v62 = vsel %vm55_vm0, %v1600_v61, -inf }
 0xf34   :  { %1623 = vmax.xlane.f32.xlu0 %v1622_v54  ;;  %v2804_v55 = vpop.f32.mrb[36].mxu0  ;;  %v1625_v15 = vsel %vm55_vm0, %v1595_v60, -inf }
 0xf35   :  { %1626 = vmax.xlane.f32.xlu1 %v1625_v15  ;;  %v1604_v36 = vpop.f32.mrb[37].mxu0  ;;  %v1610_v57 = vadd.f32 %v2804_v55, %v3501_v29 }
 0xf36   :  { %v1605_v11 = vadd.f32 %v1604_v36, %v3503_v30 }
 0xf37   :  { %v1634_v12 = vsel %vm55_vm0, %v1610_v57, -inf }
 0xf38   :  { %1620 = vmax.xlane.f32.xlu0 %v1619_v56  ;;  %v1631_v14 = vsel %vm55_vm0, %v1605_v11, -inf }
 0xf3c   :  { %1629 = vmax.xlane.f32.xlu0 %v1628_v62 }
 0xf40   :  { %1632 = vmax.xlane.f32.xlu0 %v1631_v14 }
 0xf44   :  { %1635 = vmax.xlane.f32.xlu0 %v1634_v12 }
 0xfb9   :  { %v1618_v13 = vpop.xlane.xlu0 %1617 }
 0xfba   :  { %v1638_v63 = vsub.f32 %v1580_v43, %v1618_v13 }
 0xfbc   :  { %v1647_v46 = vmul.f32 1.442695, %v1638_v63  ;;  %v3082_v63 = vpack.i.bf16 %v3646_v1, %v3644_v5 }
 0xfbd   :  { %v1615_v6 = vpop.xlane.xlu0 %1614 }
 0xfbe   :  { %3184 = vpow2.f32 %v1647_v46  ;;  %v1637_v39 = vsub.f32 %v1575_v8, %v1615_v6  ;;  %v3087_v46 = vpack.i.bf16 %v3652_v4, %v3650_v3 }
 0xfc0   :  { %v1645_v19 = vmul.f32 1.442695, %v1637_v39 }
 0xfc1   :  { %v1624_v17 = vpop.xlane.xlu0 %1623 }
 0xfc2   :  { %3186 = vpow2.f32 %v1645_v19  ;;  %v1640_v30 = vsub.f32 %v1590_v18, %v1624_v17  ;;  %v1627_v51 = vpop.xlane.xlu1 %1626 }
 0xfc3   :  { %v1641_v27 = vsub.f32 %v1595_v60, %v1627_v51 }
 0xfc4   :  { %v1651_v38 = vmul.f32 1.442695, %v1640_v30 }
 0xfc5   :  { %v1621_v29 = vpop.xlane.xlu0 %1620  ;;  %v1653_v48 = vmul.f32 1.442695, %v1641_v27 }
 0xfc6   :  { %3188 = vpow2.f32 %v1651_v38  ;;  %v1639_v32 = vsub.f32 %v1585_v10, %v1621_v29 }
 0xfc8   :  { %v3722_v59 = vpop.eup %3184  ;;  %v1649_v28 = vmul.f32 1.442695, %v1639_v32 }
 0xfc9   :  { %v1630_v52 = vpop.xlane.xlu0 %1629  ;;  %v1664_v43 = vsel %vm55_vm0, %v3722_v59, 0.0 }
 0xfca   :  { %3190 = vpow2.f32 %v1649_v28  ;;  %v1642_v8 = vsub.f32 %v1600_v61, %v1630_v52  ;;  %1665 = vadd.xlane.f32.xlu0 %v1664_v43 }
 0xfcb   :  { %3192 = vpow2.f32 %v1653_v48 }
 0xfcc   :  { %v3187_v53 = vpop.eup %3186  ;;  %v1655_v9 = vmul.f32 1.442695, %v1642_v8 }
 0xfcd   :  { %v1633_v2 = vpop.xlane.xlu0 %1632  ;;  %v1661_v18 = vsel %vm55_vm0, %v3187_v53, 0.0 }
 0xfce   :  { %v1643_v16 = vsub.f32 %v1605_v11, %v1633_v2  ;;  %1662 = vadd.xlane.f32.xlu0 %v1661_v18  ;;  %3194 = vpow2.f32 %v1655_v9 }
 0xfd0   :  { %v3727_v41 = vpop.eup %3188  ;;  %v1657_v40 = vmul.f32 1.442695, %v1643_v16 }
 0xfd1   :  { %v1636_v60 = vpop.xlane.xlu0 %1635  ;;  %v1670_v10 = vsel %vm55_vm0, %v3727_v41, 0.0 }
 0xfd2   :  { %3196 = vpow2.f32 %v1657_v40  ;;  %v1644_v54 = vsub.f32 %v1610_v57, %v1636_v60  ;;  %1671 = vadd.xlane.f32.xlu0 %v1670_v10 }
 0xfd4   :  { %v3191_v55 = vpop.eup %3190  ;;  %v1659_v15 = vmul.f32 1.442695, %v1644_v54 }
 0xfd5   :  { %v1667_v36 = vsel %vm55_vm0, %v3191_v55, 0.0  ;;  %v3193_v61 = vpop.eup %3192 }
 0xfd6   :  { %3198 = vpow2.f32 %v1659_v15  ;;  %1668 = vadd.xlane.f32.xlu0 %v1667_v36  ;;  %v1673_v56 = vsel %vm55_vm0, %v3193_v61, 0.0 }
 0xfd8   :  { %v3195_v11 = vpop.eup %3194 }
 0xfd9   :  { %v1676_v14 = vsel %vm55_vm0, %v3195_v11, 0.0 }
 0xfda   :  { %1674 = vadd.xlane.f32.xlu0 %v1673_v56 }
 0xfdc   :  { %v3197_v62 = vpop.eup %3196 }
 0xfdd   :  { %v1679_v12 = vsel %vm55_vm0, %v3197_v62, 0.0 }
 0xfde   :  { %1677 = vadd.xlane.f32.xlu0 %v1676_v14  ;;  %1680 = vadd.xlane.f32.xlu1 %v1679_v12 }
 0xfe0   :  { %v3199_v57 = vpop.eup %3198 }
 0xfe1   :  { %v1682_v13 = vsel %vm55_vm0, %v3199_v57, 0.0 }
 0xfe2   :  { %1683 = vadd.xlane.f32.xlu0 %v1682_v13 }
 0xfef   :  { %3078 = vrot.lane.b32.xlu1 %v3668_v42, %s3287_s27 }
 0xff3   :  { %3088 = vrot.lane.b32.xlu1 %v3087_v46, %s3288_s28 }
 0xff8   :  { %3083 = vrot.lane.b32.xlu0 %v3082_v63, %s3288_s28 }
0x1057   :  { %v1666_v6 = vpop.xlane.xlu0 %1665 }
0x105b   :  { %v1663_v39 = vpop.xlane.xlu0 %1662 }
0x105c   :  { %3200 = vrcp.f32 %v1663_v39 }
0x105d   :  { %3202 = vrcp.f32 %v1666_v6 }
0x105f   :  { %v1672_v19 = vpop.xlane.xlu0 %1671 }
0x1063   :  { %v1669_v17 = vpop.xlane.xlu0 %1668 }
0x1064   :  { %3204 = vrcp.f32 %v1669_v17 }
0x1065   :  { %3206 = vrcp.f32 %v1672_v19 }
0x1066   :  { %v3201_v30 = vpop.eup %3200 }
0x1067   :  { %v1675_v51 = vpop.xlane.xlu0 %1674  ;;  %v1693_v38 = vmul.f32 %v3201_v30, %v3187_v53  ;;  %v3203_v32 = vpop.eup %3202 }
0x1068   :  { %3208 = vrcp.f32 %v1675_v51  ;;  %v1694_v28 = vmul.f32 %v3203_v32, %v3722_v59 }
0x1069   :  { %2809 = vmatprep.mubr.msk.f32.mxu1 %vm55_vm0, %v1693_v38 }
0x106b   :  { %v1681_v5 = vpop.xlane.xlu1 %1680  ;;  %v1678_v1 = vpop.xlane.xlu0 %1677 }
0x106c   :  { %3210 = vrcp.f32 %v1678_v1 }
0x106d   :  { %3212 = vrcp.f32 %v1681_v5 }
0x106e   :  { %v3205_v48 = vpop.eup %3204 }
0x106f   :  { %v3079_v3 = vpop.permute.xlu1 %3078  ;;  %v1684_v29 = vpop.xlane.xlu0 %1683  ;;  %v1695_v43 = vmul.f32 %v3205_v48, %v3191_v55 }
0x1070   :  { %v3081_v4 = vunpack.i.h.bf16 %v3079_v3  ;;  %v3080_v42 = vunpack.i.l.bf16 %v3079_v3  ;;  %3214 = vrcp.f32 %v1684_v29  ;;  %v3207_v52 = vpop.eup %3206 }
0x1071   :  { %v1696_v53 = vmul.f32 %v3207_v52, %v3727_v41 }
0x1072   :  { %v2981_v27 = vpack.c.bf16 %v3081_v4, %v3080_v42  ;;  %v3209_v8 = vpop.eup %3208 }
0x1073   :  { %v1697_v2 = vmul.f32 %v3209_v8, %v3193_v61  ;;  %v3084_v10 = vpop.permute.xlu0 %3083  ;;  %v3089_v15 = vpop.permute.xlu1 %3088 }
0x1074   :  { %2982 = vmatprep.subr.bf16.mxu1 %v2981_v27  ;;  %v3086_v54 = vunpack.i.h.bf16 %v3084_v10  ;;  %v3085_v41 = vunpack.i.l.bf16 %v3084_v10  ;;  %v3091_v36 = vunpack.i.h.bf16 %v3089_v15  ;;  %v3090_v61 = vunpack.i.l.bf16 %v3089_v15  ;;  %v1235_v10 = vld [vmem:[#allocation2 + $0x88] sm:$0xff]  ;;  %v3879_v15 = vld [vmem:[#allocation8_spill] sm:$0xff] }
0x1075   :  { %2984 = vmatpush3.bf16.msra.mxu1 %v2981_v27 }
0x1076   :  { %v3211_v9 = vpop.eup %3210  ;;  %v2985_v55 = vpack.c.bf16 %v3086_v54, %v3085_v41  ;;  %v2989_v56 = vpack.c.bf16 %v3091_v36, %v3090_v61  ;;  %v3092_v41 = vpack.i.bf16 %v3576_v24, %v3574_v7  ;;  %v3880_v36 = vld [vmem:[#allocation9_spill] sm:$0xff]  ;;  %v3885_v24 = vld [vmem:[#allocation14_spill] sm:$0xff] }
0x1077   :  { %v3213_v18 = vpop.eup %3212  ;;  %v1698_v16 = vmul.f32 %v3211_v9, %v3195_v11  ;;  %v3102_v61 = vpack.i.bf16 %v3880_v36, %v3879_v15 }
0x1078   :  { %2810 = vmatmul.mubr.msk.f32.vlgmr.msra.gmra.mrb[14].mxu1 %vm55_vm0, %v1694_v28  ;;  %v1699_v60 = vmul.f32 %v3213_v18, %v3197_v62  ;;  %2986 = vmatprep.subr.bf16.mxu1 %v2985_v55 }
0x1079   :  { %2812 = vmatprep.mubr.msk.f32.mxu1 %vm55_vm0, %v1695_v43  ;;  %2988 = vmatpush3.bf16.msra.mxu1 %v2985_v55  ;;  %v3097_v55 = vpack.i.bf16 %v3582_v34, %v3580_v33  ;;  %v3887_v34 = vld [vmem:[#allocation16_spill] sm:$0xff] }
0x107a   :  { %v3215_v40 = vpop.eup %3214  ;;  %2990 = vmatprep.subr.bf16.mxu1 %v2989_v56 }
0x107b   :  { %v1700_v59 = vmul.f32 %v3215_v40, %v3199_v57  ;;  %v1233_v40 = vld [vmem:[#allocation2 + $0x78] sm:$0xff] }
0x107c   :  { %2813 = vmatmul.mubr.msk.f32.gmra.mrb[16].mxu1 %vm55_vm0, %v1696_v53 }
0x107d   :  { %2815 = vmatprep.mubr.msk.f32.mxu1 %vm55_vm0, %v1697_v2  ;;  %2992 = vmatpush3.bf16.msra.mxu1 %v2989_v56  ;;  %v3881_v56 = vld [vmem:[#allocation10_spill] sm:$0xff] }
0x1080   :  { %2816 = vmatmul.mubr.msk.f32.gmra.mrb[18].mxu1 %vm55_vm0, %v1698_v16  ;;  %v1232_v16 = vld [vmem:[#allocation2 + $0x70] sm:$0xff] }
0x1081   :  { %2818 = vmatprep.mubr.msk.f32.mxu1 %vm55_vm0, %v1699_v60  ;;  %v2993_v60 = vpack.c.bf16 %v1233_v40, %v1232_v16 }
0x1083   :  { %2994 = vmatprep.subr.bf16.mxu1 %v2993_v60 }
0x1084   :  { %2819 = vmatmul.mubr.msk.f32.gmra.mrb[20].mxu1 %vm55_vm0, %v1700_v59  ;;  %v1234_v59 = vld [vmem:[#allocation2 + $0x80] sm:$0xff] }
0x1085   :  { %v2997_v54 = vpack.c.bf16 %v1235_v10, %v1234_v59 }
0x114b   :  { %v2811_v11 = vpop.f32.mrb[14].mxu1 }
0x114c   :  { %v1797_v62 = vpop.f32.mrb[15].mxu1  ;;  %v1837_v12 = vmul.f32 %v2811_v11, %v3447_v21  ;;  %v3882_v11 = vld [vmem:[#allocation11_spill] sm:$0xff] }
0x114d   :  { %v1836_v63 = vmul.f32 %v1797_v62, %v3449_v22  ;;  %v3107_v62 = vpack.i.bf16 %v3882_v11, %v3881_v56 }
0x114f   :  { %v2814_v14 = vpop.f32.mrb[16].mxu1 }
0x1150   :  { %v1839_v57 = vmul.f32 %v2814_v14, %v3453_v25  ;;  %v1807_v13 = vpop.f32.mrb[17].mxu1  ;;  %v3883_v14 = vld [vmem:[#allocation12_spill] sm:$0xff] }
0x1151   :  { %v1838_v46 = vmul.f32 %v1807_v13, %v3451_v23  ;;  %v3878_v23 = vsub.s32 3, %v3356_v45  ;;  %v3888_v13 = vld [vmem:[#allocation17_spill] sm:$0xff] }
0x1152   :  { %v1845_v6 = vadd.f32 %v1839_v57, %v1837_v12  ;;  %v3884_v12 = vld [vmem:[#allocation13_spill] sm:$0xff]  ;;  %v3886_v57 = vld [vmem:[#allocation15_spill] sm:$0xff] }
0x1153   :  { %v1844_v39 = vadd.f32 %v1838_v46, %v1836_v63  ;;  %v2817_v19 = vpop.f32.mrb[18].mxu1  ;;  %v3112_v7 = vpack.i.bf16 %v3884_v12, %v3883_v14  ;;  %v3117_v33 = vpack.i.bf16 %v3886_v57, %v3885_v24  ;;  %v3122_v63 = vpack.i.bf16 %v3888_v13, %v3887_v34  ;;  %v3889_v46 = vld [vmem:[#allocation18_spill] sm:$0xff] }
0x1154   :  { %v1841_v17 = vmul.f32 %v2817_v19, %v3462_v37  ;;  %v1817_v30 = vpop.f32.mrb[19].mxu1  ;;  %v1952_v37 = vrot.slane %v3656_v58, %v3878_v23  ;;  %v3892_v23 = vsub.s32 5, %v3356_v45  ;;  %v3893_v34 = vsub.s32 6, %v3356_v45 }
0x1155   :  { %v1840_v51 = vmul.f32 %v1817_v30, %v3459_v31 }
0x1156   :  { %v1847_v38 = vadd.f32 %v1845_v6, %v1841_v17  ;;  %v3890_v6 = vld [vmem:[#allocation19_spill] sm:$0xff]  ;;  %v1996_v13 = vrot.slane %v3656_v58, %v3893_v34 }
0x1157   :  { %v1846_v5 = vadd.f32 %v1844_v39, %v1840_v51  ;;  %v2820_v1 = vpop.f32.mrb[20].mxu1  ;;  %v3127_v39 = vpack.i.bf16 %v3890_v6, %v3889_v46 }
0x1158   :  { %v1843_v21 = vmul.f32 %v2820_v1, %v3472_v50  ;;  %v1827_v3 = vpop.f32.mrb[21].mxu1  ;;  %v3891_v1 = vsub.s32 4, %v3356_v45 }
0x1159   :  { %v1842_v25 = vmul.f32 %v1827_v3, %v3469_v44 }
0x115a   :  { %v1849_v4 = vadd.f32 %v1847_v38, %v1843_v21  ;;  %v1984_v21 = vrot.slane %v3656_v58, %v3891_v1 }
0x115b   :  { %v1848_v22 = vadd.f32 %v1846_v5, %v1842_v25 }
0x115d   :  { %2829 = vmatprep.mubr.msk.f32.mxu1 %vm173_vm3, %v1848_v22 }
0x115e   :  { %2830 = vmatmul.mubr.msk.f32.vlgmr.msra.gmra.mrb[22].mxu1 %vm173_vm3, %v1849_v4 }
0x115f   :  { %2996 = vmatpush3.bf16.msra.mxu1 %v2993_v60 }
0x1160   :  { %2998 = vmatprep.subr.bf16.mxu1 %v2997_v54 }
0x1163   :  { %3000 = vmatpush3.bf16.msra.mxu1 %v2997_v54 }
0x1231   :  { %v2831_v42 = vpop.f32.mrb[22].mxu1 }
0x1232   :  { %v1948_v31 = vadd.f32 %v2831_v42, %v3632_v26  ;;  %v1938_v27 = vpop.f32.mrb[23].mxu1 }
0x1233   :  { %v1947_v29 = vadd.f32 %v1938_v27, %v3634_v20 }
0x1234   :  { %v3769_v50 = vadd.f32 %v1952_v37, %v1948_v31 }
0x1235   :  { %v3771_v32 = vadd.f32 %v1952_v37, %v1947_v29  ;;  %v1990_v37 = vrot.slane %v3656_v58, %v3892_v23 }
0x1236   :  { %v1958_v44 = vsel %vm173_vm3, %v3769_v50, 0.0 }
0x1237   :  { %1959 = vadd.xlane.f32.xlu0 %v1958_v44  ;;  %v1955_v48 = vsel %vm173_vm3, %v3771_v32, 0.0 }
0x1238   :  { %1956 = vadd.xlane.f32.xlu1 %v1955_v48 }
0x12c4   :  { %v1960_v28 = vpop.xlane.xlu0 %1959 }
0x12c5   :  { %v1962_v52 = vmul.f32 0.03125, %v1960_v28  ;;  %v1957_v43 = vpop.xlane.xlu1 %1956 }
0x12c6   :  { %v1961_v8 = vmul.f32 0.03125, %v1957_v43 }
0x12c7   :  { %v1964_v26 = vsub.f32 %v3769_v50, %v1962_v52 }
0x12c8   :  { %v1963_v20 = vsub.f32 %v3771_v32, %v1961_v8 }
0x12c9   :  { %v1966_v53 = vmul.f32 %v1964_v26, %v1964_v26 }
0x12ca   :  { %v1965_v9 = vmul.f32 %v1963_v20, %v1963_v20 }
0x12cb   :  { %v1970_v2 = vsel %vm173_vm3, %v1966_v53, 0.0 }
0x12cc   :  { %1971 = vadd.xlane.f32.xlu1 %v1970_v2  ;;  %v1967_v18 = vsel %vm173_vm3, %v1965_v9, 0.0 }
0x12cd   :  { %1968 = vadd.xlane.f32.xlu0 %v1967_v18 }
0x12dd   :  { %3098 = vrot.lane.b32.xlu1 %v3097_v55, %s3284_s1 }
0x12e1   :  { %3103 = vrot.lane.b32.xlu1 %v3102_v61, %s3284_s1 }
0x12e3   :  { %3093 = vrot.lane.b32.xlu0 %v3092_v41, %s3284_s1 }
0x12e5   :  { %3113 = vrot.lane.b32.xlu1 %v3112_v7, %s3284_s1 }
0x12e7   :  { %3108 = vrot.lane.b32.xlu0 %v3107_v62, %s3284_s1 }
0x12e9   :  { %3123 = vrot.lane.b32.xlu1 %v3122_v63, %s3284_s1 }
0x12eb   :  { %3118 = vrot.lane.b32.xlu0 %v3117_v33, %s3284_s1 }
0x12ef   :  { %3128 = vrot.lane.b32.xlu0 %v3127_v39, %s3284_s1 }
0x1359   :  { %v1972_v19 = vpop.xlane.xlu1 %1971 }
0x135a   :  { %v1974_v17 = vmul.f32 0.03125, %v1972_v19  ;;  %v1969_v30 = vpop.xlane.xlu0 %1968 }
0x135b   :  { %v1973_v51 = vmul.f32 0.03125, %v1969_v30 }
0x135c   :  { %v1976_v38 = vadd.f32 1e-05, %v1974_v17 }
0x135d   :  { %v1975_v5 = vadd.f32 1e-05, %v1973_v51  ;;  %v3099_v43 = vpop.permute.xlu1 %3098 }
0x135e   :  { %3216 = vrsqrt.f32 %v1976_v38  ;;  %v3094_v44 = vpop.permute.xlu0 %3093  ;;  %v3101_v8 = vunpack.i.h.bf16 %v3099_v43 }
0x135f   :  { %3218 = vrsqrt.f32 %v1975_v5  ;;  %v3096_v48 = vunpack.i.h.bf16 %v3094_v44  ;;  %v3095_v28 = vunpack.i.l.bf16 %v3094_v44 }
0x1361   :  { %v3001_v52 = vpack.c.bf16 %v3096_v48, %v3095_v28  ;;  %v3104_v53 = vpop.permute.xlu1 %3103 }
0x1362   :  { %v3106_v9 = vunpack.i.h.bf16 %v3104_v53  ;;  %v3105_v2 = vunpack.i.l.bf16 %v3104_v53  ;;  %v3109_v16 = vpop.permute.xlu0 %3108 }
0x1363   :  { %3002 = vmatprep.subr.bf16.mxu0 %v3001_v52  ;;  %v3111_v40 = vunpack.i.h.bf16 %v3109_v16  ;;  %v3110_v60 = vunpack.i.l.bf16 %v3109_v16 }
0x1364   :  { %3004 = vmatpush3.bf16.msra.mxu0 %v3001_v52  ;;  %v3009_v18 = vpack.c.bf16 %v3106_v9, %v3105_v2 }
0x1365   :  { %v3013_v59 = vpack.c.bf16 %v3111_v40, %v3110_v60  ;;  %v3114_v10 = vpop.permute.xlu1 %3113 }
0x1366   :  { %v3116_v54 = vunpack.i.h.bf16 %v3114_v10  ;;  %v3115_v41 = vunpack.i.l.bf16 %v3114_v10  ;;  %v3119_v15 = vpop.permute.xlu0 %3118 }
0x1367   :  { %v3121_v36 = vunpack.i.h.bf16 %v3119_v15  ;;  %v3120_v61 = vunpack.i.l.bf16 %v3119_v15 }
0x1368   :  { %v3217_v3 = vpop.eup %3216  ;;  %v3017_v55 = vpack.c.bf16 %v3116_v54, %v3115_v41 }
0x1369   :  { %v3219_v25 = vpop.eup %3218  ;;  %v1980_v4 = vmul.f32 %v3217_v3, %v1964_v26  ;;  %v3100_v26 = vunpack.i.l.bf16 %v3099_v43  ;;  %v3021_v56 = vpack.c.bf16 %v3121_v36, %v3120_v61  ;;  %v3124_v11 = vpop.permute.xlu1 %3123 }
0x136a   :  { %v1979_v22 = vmul.f32 %v3219_v25, %v1963_v20  ;;  %v3126_v62 = vunpack.i.h.bf16 %v3124_v11  ;;  %v3125_v14 = vunpack.i.l.bf16 %v3124_v11  ;;  %v3129_v7 = vpop.permute.xlu0 %3128 }
0x136b   :  { %v1986_v42 = vmul.f32 %v1984_v21, %v1980_v4  ;;  %v3005_v20 = vpack.c.bf16 %v3101_v8, %v3100_v26  ;;  %v3131_v24 = vunpack.i.h.bf16 %v3129_v7  ;;  %v3130_v57 = vunpack.i.l.bf16 %v3129_v7 }
0x136c   :  { %v1985_v31 = vmul.f32 %v1984_v21, %v1979_v22  ;;  %v3025_v12 = vpack.c.bf16 %v3126_v62, %v3125_v14 }
0x136d   :  { %v1992_v29 = vadd.f32 %v1990_v37, %v1986_v42  ;;  %3006 = vmatprep.subr.bf16.mxu0 %v3005_v20  ;;  %v3029_v33 = vpack.c.bf16 %v3131_v24, %v3130_v57 }
0x136e   :  { %v1991_v27 = vadd.f32 %v1990_v37, %v1985_v31  ;;  %3008 = vmatpush3.bf16.msra.mxu0 %v3005_v20 }
0x136f   :  { %3010 = vmatprep.subr.bf16.mxu0 %v3009_v18 }
0x1370   :  { %2840 = vmatprep.mubr.msk.f32.mxu1 %vm173_vm3, %v1991_v27 }
0x1371   :  { %2841 = vmatmul.mubr.msk.f32.vlgmr.msra.gmra.mrb[24].mxu1 %vm173_vm3, %v1992_v29 }
0x1372   :  { %3012 = vmatpush3.bf16.msra.mxu0 %v3009_v18 }
0x1373   :  { %3014 = vmatprep.subr.bf16.mxu0 %v3013_v59 }
0x1376   :  { %3016 = vmatpush3.bf16.msra.mxu0 %v3013_v59 }
0x1377   :  { %3018 = vmatprep.subr.bf16.mxu0 %v3017_v55 }
0x137a   :  { %3020 = vmatpush3.bf16.msra.mxu0 %v3017_v55 }
0x137b   :  { %3022 = vmatprep.subr.bf16.mxu0 %v3021_v56 }
0x137e   :  { %3024 = vmatpush3.bf16.msra.mxu0 %v3021_v56 }
0x137f   :  { %3026 = vmatprep.subr.bf16.mxu0 %v3025_v12 }
0x1382   :  { %3028 = vmatpush3.bf16.msra.mxu0 %v3025_v12 }
0x1383   :  { %3030 = vmatprep.subr.bf16.mxu0 %v3029_v33 }
0x1386   :  { %3032 = vmatpush3.bf16.msra.mxu0 %v3029_v33 }
0x1444   :  { %v2842_v63 = vpop.f32.mrb[24].mxu1 }
0x1445   :  { %v2075_v46 = vadd.f32 %v2842_v63, %v1996_v13  ;;  %v2069_v6 = vpop.f32.mrb[25].mxu1  ;;  %v2278_v63 = vrot.slane %v3656_v58, %v1224_v35 }
0x1446   :  { %v2070_v39 = vadd.f32 %v2069_v6, %v1996_v13 }
0x1447   :  { %v2081_v19 = vmul.f32 0.70710677, %v2075_v46  ;;  %v2079_v33 = vmul.f32 0.5, %v2075_v46 }
0x1448   :  { %v2080_v17 = vmul.f32 0.70710677, %v2070_v39  ;;  %v2078_v24 = vmul.f32 0.5, %v2070_v39 }
0x1449   :  { %v2083_v30 = vsub.f32 0.0, %v2081_v19  ;;  %vm2125_vm7 = vcmp.lt.f32.partialorder %v2081_v19, 0.0 }
0x144a   :  { %v2082_v51 = vsub.f32 0.0, %v2080_v17  ;;  %vm2124_vm8 = vcmp.lt.f32.partialorder %v2080_v17, 0.0 }
0x144b   :  { %v2085_v38 = vmax.f32 %v2081_v19, %v2083_v30 }
0x144c   :  { %v2084_v5 = vmax.f32 %v2080_v17, %v2082_v51 }
0x144d   :  { %v2087_v1 = vmul.f32 0.3275911, %v2085_v38  ;;  %v2113_v4 = vsub.f32 0.0, %v2085_v38 }
0x144e   :  { %v2086_v21 = vmul.f32 0.3275911, %v2084_v5  ;;  %v2112_v22 = vsub.f32 0.0, %v2084_v5 }
0x144f   :  { %v2089_v3 = vadd.f32 1.0, %v2087_v1  ;;  %v2115_v37 = vmul.f32 %v2113_v4, %v2085_v38  ;;  %v2319_v4 = vld [vmem:[#allocation2 + $0x150] sm:$0xff] }
0x1450   :  { %v2088_v25 = vadd.f32 1.0, %v2086_v21  ;;  %v2114_v27 = vmul.f32 %v2112_v22, %v2084_v5  ;;  %v2320_v22 = vld [vmem:[#allocation2 + $0x158] sm:$0xff] }
0x1451   :  { %3220 = vrcp.f32 %v2089_v3  ;;  %v2118_v48 = vmul.f32 1.442695, %v2115_v37  ;;  %v2321_v37 = vld [vmem:[#allocation2 + $0x160] sm:$0xff] }
0x1452   :  { %3222 = vrcp.f32 %v2088_v25  ;;  %v2116_v43 = vmul.f32 1.442695, %v2114_v27 }
0x1453   :  { %3224 = vpow2.f32 %v2118_v48 }
0x1454   :  { %3226 = vpow2.f32 %v2116_v43  ;;  %v38_v43 = vld [vmem:[#allocation2 + $0x180] sm:$0xff] }
0x145b   :  { %v3221_v23 = vpop.eup %3220 }
0x145c   :  { %v3223_v42 = vpop.eup %3222  ;;  %v2095_v31 = vmul.f32 1.0614054, %v3221_v23 }
0x145d   :  { %v2094_v29 = vmul.f32 1.0614054, %v3223_v42  ;;  %v3225_v54 = vpop.eup %3224 }
0x145e   :  { %v2097_v44 = vadd.f32 -1.4531521, %v2095_v31  ;;  %v3227_v55 = vpop.eup %3226 }
0x145f   :  { %v2096_v28 = vadd.f32 -1.4531521, %v2094_v29 }
0x1460   :  { %v2099_v52 = vmul.f32 %v3221_v23, %v2097_v44 }
0x1461   :  { %v2098_v8 = vmul.f32 %v3223_v42, %v2096_v28 }
0x1462   :  { %v2101_v26 = vadd.f32 1.4214138, %v2099_v52 }
0x1463   :  { %v2100_v20 = vadd.f32 1.4214138, %v2098_v8  ;;  %v2310_v8 = vrot.slane %v38_v43, %v3359_v47 }
0x1464   :  { %v2103_v53 = vmul.f32 %v3221_v23, %v2101_v26 }
0x1465   :  { %v2102_v9 = vmul.f32 %v3223_v42, %v2100_v20 }
0x1466   :  { %v2105_v2 = vadd.f32 -0.28449672, %v2103_v53 }
0x1467   :  { %v2104_v18 = vadd.f32 -0.28449672, %v2102_v9 }
0x1468   :  { %v2107_v16 = vmul.f32 %v3221_v23, %v2105_v2  ;;  %v2316_v2 = vrot.slane %v38_v43, %v3364_v49 }
0x1469   :  { %v2106_v40 = vmul.f32 %v3223_v42, %v2104_v18 }
0x146a   :  { %v2109_v60 = vadd.f32 0.2548296, %v2107_v16 }
0x146b   :  { %v2108_v59 = vadd.f32 0.2548296, %v2106_v40 }
0x146c   :  { %v2111_v10 = vmul.f32 %v3221_v23, %v2109_v60  ;;  %v3033_v23 = vpack.c.bf16 %v2320_v22, %v2319_v4 }
0x146d   :  { %v2110_v41 = vmul.f32 %v3223_v42, %v2108_v59  ;;  %v2322_v42 = vld [vmem:[#allocation2 + $0x168] sm:$0xff]  ;;  %v2326_v59 = vrot.slane %v38_v43, %v3391_v0 }
0x146e   :  { %v2121_v15 = vmul.f32 %v3225_v54, %v2111_v10  ;;  %3034 = vmatprep.subr.bf16.mxu1 %v3033_v23  ;;  %v3037_v31 = vpack.c.bf16 %v2322_v42, %v2321_v37 }
0x146f   :  { %v2120_v36 = vmul.f32 %v3227_v55, %v2110_v41  ;;  %3036 = vmatpush3.bf16.msra.mxu1 %v3033_v23 }
0x1470   :  { %v2123_v61 = vsub.f32 1.0, %v2121_v15  ;;  %3038 = vmatprep.subr.bf16.mxu1 %v3037_v31 }
0x1471   :  { %v2122_v56 = vsub.f32 1.0, %v2120_v36 }
0x1472   :  { %v2127_v11 = vsub.f32 0.0, %v2123_v61 }
0x1473   :  { %v2126_v62 = vsub.f32 0.0, %v2122_v56  ;;  %3040 = vmatpush3.bf16.msra.mxu1 %v3037_v31 }
0x1474   :  { %v2129_v14 = vsel %vm2125_vm7, %v2127_v11, %v2123_v61 }
0x1475   :  { %v2131_v12 = vadd.f32 1.0, %v2129_v14  ;;  %v2128_v7 = vsel %vm2124_vm8, %v2126_v62, %v2122_v56 }
0x1476   :  { %v2130_v57 = vadd.f32 1.0, %v2128_v7 }
0x1477   :  { %v2133_v13 = vmul.f32 %v2131_v12, %v2079_v33 }
0x1478   :  { %v2132_v34 = vmul.f32 %v2130_v57, %v2078_v24 }
0x147a   :  { %2875 = vmatprep.mubr.f32.mxu0 %v2132_v34 }
0x147b   :  { %2876 = vmatmul.mubr.f32.vlgmr.msra.gmra.mrb[38].mxu0 %v2133_v13 }
0x154e   :  { %v2877_v6 = vpop.f32.mrb[38].mxu0 }
0x154f   :  { %v2274_v30 = vadd.f32 %v2877_v6, %v3769_v50  ;;  %v2264_v19 = vpop.f32.mrb[39].mxu0 }
0x1550   :  { %v2273_v51 = vadd.f32 %v2264_v19, %v3771_v32 }
0x1551   :  { %v2280_v17 = vadd.f32 %v2278_v63, %v2274_v30 }
0x1552   :  { %v2279_v38 = vadd.f32 %v2278_v63, %v2273_v51 }
0x1553   :  { %v2284_v39 = vsel %vm173_vm3, %v2280_v17, 0.0 }
0x1554   :  { %2285 = vadd.xlane.f32.xlu0 %v2284_v39  ;;  %v2281_v46 = vsel %vm173_vm3, %v2279_v38, 0.0 }
0x1555   :  { %2282 = vadd.xlane.f32.xlu1 %v2281_v46 }
0x15e1   :  { %v2286_v5 = vpop.xlane.xlu0 %2285 }
0x15e2   :  { %v2288_v1 = vmul.f32 0.03125, %v2286_v5  ;;  %v2283_v21 = vpop.xlane.xlu1 %2282 }
0x15e3   :  { %v2287_v45 = vmul.f32 0.03125, %v2283_v21 }
0x15e4   :  { %v2290_v3 = vsub.f32 %v2280_v17, %v2288_v1 }
0x15e5   :  { %v2289_v35 = vsub.f32 %v2279_v38, %v2287_v45 }
0x15e6   :  { %v2292_v58 = vmul.f32 %v2290_v3, %v2290_v3 }
0x15e7   :  { %v2291_v25 = vmul.f32 %v2289_v35, %v2289_v35 }
0x15e8   :  { %v2296_v50 = vsel %vm173_vm3, %v2292_v58, 0.0 }
0x15e9   :  { %2297 = vadd.xlane.f32.xlu1 %v2296_v50  ;;  %v2293_v32 = vsel %vm173_vm3, %v2291_v25, 0.0 }
0x15ea   :  { %2294 = vadd.xlane.f32.xlu0 %v2293_v32 }
0x1676   :  { %v2298_v27 = vpop.xlane.xlu1 %2297 }
0x1677   :  { %v2300_v29 = vmul.f32 0.03125, %v2298_v27  ;;  %v2295_v44 = vpop.xlane.xlu0 %2294 }
0x1678   :  { %v2299_v48 = vmul.f32 0.03125, %v2295_v44 }
0x1679   :  { %v2302_v28 = vadd.f32 1e-05, %v2300_v29 }
0x167a   :  { %v2301_v52 = vadd.f32 1e-05, %v2299_v48 }
0x167b   :  { %3228 = vrsqrt.f32 %v2302_v28 }
0x167c   :  { %3230 = vrsqrt.f32 %v2301_v52 }
0x1685   :  { %v3229_v26 = vpop.eup %3228 }
0x1686   :  { %v3231_v20 = vpop.eup %3230  ;;  %v2306_v53 = vmul.f32 %v3229_v26, %v2290_v3 }
0x1687   :  { %v2305_v9 = vmul.f32 %v3231_v20, %v2289_v35 }
0x1688   :  { %v2312_v18 = vmul.f32 %v2310_v8, %v2306_v53 }
0x1689   :  { %v2311_v16 = vmul.f32 %v2310_v8, %v2305_v9 }
0x168a   :  { %v2318_v60 = vadd.f32 %v2316_v2, %v2312_v18 }
0x168b   :  { %v2317_v40 = vadd.f32 %v2316_v2, %v2311_v16 }
0x168d   :  { %2886 = vmatprep.mubr.msk.f32.mxu1 %vm173_vm3, %v2317_v40 }
0x168e   :  { %2887 = vmatmul.mubr.msk.f32.vlgmr.msra.gmra.mrb[26].mxu1 %vm173_vm3, %v2318_v60 }
0x1761   :  { %v2888_v10 = vpop.f32.mrb[26].mxu1 }
0x1762   :  { %v2405_v47 = vadd.f32 %v2888_v10, %v2326_v59  ;;  %v2399_v54 = vpop.f32.mrb[27].mxu1 }
0x1763   :  { %v2400_v41 = vadd.f32 %v2399_v54, %v2326_v59 }
0x1764   :  { %2409 = vst [vmem:[#allocation5 + $0x8] sm:$0xff] %v2405_v47 }
0x1765   :  { %2408 = vst [vmem:[#allocation5] sm:$0xff] %v2400_v41 }
0x1766   :  { %3265 = shalt.err (!%p3262_p12)
}
0x1767   :  { %s3266_s6 = scalar_lea.hbm %s3847_s2, 256 }
0x1768   :  { %p3267_p13 = scmp.ne.s32.totalorder %s3847_s2, %s3266_s6  ;;  %p3270_p0 = scmp.lt.u32.totalorder %s3266_s6, %s3847_s2 }
0x176a   :  { %p3272_p1 = pnand %p3270_p0, %p3267_p13 }
0x176c   :  { %3275 = shalt.err (!%p3272_p1)
}
0x176d   :  { %2421 = dma.vmem_to_hbm [thread:$0]  %s2416_s30, 256, %s3847_s2, [#allocation4], %s3281_s19, %s3281_s19, %s3282_s20  }
0x176e   :  { %3278 = dma.done.wait [#allocation4], 256  }
0x176f   :  { %3279 = vsyncadd [#allocation4], 4294967040 }
0x1770   :  { %2425 = vsyncpa [#allocation3], 1 }
0x1771   :  { %2426 = vsyncpa [#allocation4], 1 }

</bundles_post_ra>
